<compile_context>
chip_gen: v7x
topology: tpu7x:2x2x1
jax: 0.10.0
libtpu: 0.0.40
codegen_flags: <defaults>
</compile_context>

<pallas_src>
import jax
import jax.numpy as jnp
from jax.experimental import pallas as pl
from jax.experimental.pallas import tpu as pltpu


def _value_fn_kernel(p_ref, sa_ref,                       # streamed batch tiles
                     we1_ref, be1_ref,                     # embedding net layer 1
                     we2_ref, be2_ref,                     # embedding net layer 2 (-> E)
                     wv1e_ref, wv1sa_ref, bv1_ref,         # eval net layer 1 (split concat)
                     wv2_ref, bv2_ref,                     # eval net output layer (H2 -> 1)
                     out_ref):
    cd = we1_ref.dtype  # matmul-input dtype (f32 or bf16); accumulation is always f32

    # Streams arrive in the caller's dtype; cast (if needed) in-kernel, right before the
    # MXU dot, instead of paying an extra HBM pass in the wrapper.
    p = p_ref[...].astype(cd)
    sa = sa_ref[...].astype(cd)

    # --- embedding_net (assumed 2-layer ReLU MLP) ---
    h1 = jnp.dot(p, we1_ref[...], preferred_element_type=jnp.float32) + be1_ref[...]
    h1 = jnp.maximum(h1, 0.0)
    emb = jnp.dot(h1.astype(cd), we2_ref[...],
                  preferred_element_type=jnp.float32) + be2_ref[...]
    emb = jnp.maximum(emb, 0.0)
    # .flatten(start_dim=1) is a no-op for 2-D embeddings.

    # --- evaluation_net on hstack([emb, states, actions]) ---
    # concat folded into split weights: x @ [We; Wsa] == emb @ We + [s|a] @ Wsa
    h2 = (jnp.dot(emb.astype(cd), wv1e_ref[...], preferred_element_type=jnp.float32)
          + jnp.dot(sa, wv1sa_ref[...], preferred_element_type=jnp.float32)
          + bv1_ref[...])
    h2 = jnp.maximum(h2, 0.0)

    # Final layer (H2 -> 1): VPU multiply + XLU lane reduce, stored as a (tb, 1) column
    # block (no sublane->lane relayout; masked store is cheap at tb >= 512).
    v = jnp.sum(h2 * wv2_ref[...].astype(jnp.float32), axis=-1, keepdims=True)
    out_ref[...] = (v + bv2_ref[...]).astype(out_ref.dtype)


def _pick_batch_tile(B, requested):
    """Pick a batch tile: as large as requested, but keep >=~4 grid steps when the batch
    allows it (pipelining on v5e/v6e, megacore sharding on v7x), and never exceed the
    (sublane-rounded) batch itself."""
    target = ((pl.cdiv(B, 4) + 127) // 128) * 128     # multiple of 128, ~4 steps
    tb = max(128, min(int(requested), target))
    tb = min(tb, ((B + 7) // 8) * 8)                  # tiny batches: one full block
    return tb


def policy_conditioned_value(mlp_parameters, states, actions, params,
                             *, batch_tile=512, compute_dtype=jnp.float32):
    """Fused forward pass.

    mlp_parameters: (B, P) flattened policy parameters fed to the embedding net
    states:         (B, S)
    actions:        (B, A)
    Returns (B, 1) float32 values.
    """
    (we1, be1, we2, be2, wv1, bv1, wv2, bv2) = params

    B, P = mlp_parameters.shape
    S = states.shape[1]
    A = actions.shape[1]
    SA = S + A
    H1 = we1.shape[1]         # embedding-net hidden dim
    E = we2.shape[1]          # embedding_size
    H2 = wv1.shape[1]         # evaluation-net hidden dim

    # Merge the two tiny trailing streams into one (B, S+A) input (one fewer DMA per
    # grid step). This is NOT the module's hstack with the embeddings — that concat is
    # still folded into split weights inside the kernel.
    sa = jnp.concatenate([states, actions], axis=-1)

    cd = compute_dtype
    # Resident weights in the matmul dtype (read once; bf16 halves their VMEM footprint);
    # biases stay f32 so all elementwise add/ReLU work is f32 (safe on v5e's VPU).
    we1c = we1.astype(cd)
    we2c = we2.astype(cd)
    wv1ec = wv1[:E].astype(cd)            # rows matching the embedding slice of hstack
    wv1sac = wv1[E:].astype(cd)           # rows matching [states | actions]
    wv2c = wv2.reshape(1, H2).astype(cd)  # (H2, 1) -> row for the lane reduce
    be1f = be1.reshape(1, H1).astype(jnp.float32)
    be2f = be2.reshape(1, E).astype(jnp.float32)
    bv1f = bv1.reshape(1, H2).astype(jnp.float32)
    bv2f = bv2.reshape(1, 1).astype(jnp.float32)

    tb = _pick_batch_tile(B, batch_tile)
    grid = (pl.cdiv(B, tb),)   # ragged last tile: Pallas pads reads / masks OOB writes

    # Explicit VMEM budget (streams + residents double-buffered + f32 activation temps),
    # so larger tiles stay viable under v5e's 16 MiB default scoped limit and within
    # v7x's 64 MiB physical VMEM.
    in_bytes = jnp.dtype(mlp_parameters.dtype).itemsize
    w_bytes = jnp.dtype(cd).itemsize
    resident_bytes = ((P * H1 + H1 * E + E * H2 + SA * H2 + H2) * w_bytes
                      + (H1 + E + H2 + 1) * 4)
    budget = (2 * tb * (P + SA) * in_bytes      # double-buffered streamed tiles
              + 2 * resident_bytes              # residents (still double-buffered)
              + 2 * tb * 4                      # output tiles
              + 8 * tb * max(P, H1, E, H2) * 4) # generous f32 activation temporaries
    vmem_limit = int(min(max(2 * budget, 32 * 1024 * 1024), 100 * 1024 * 1024))

    def stream(feat):
        # Batch-streamed input: new tile per grid step (double-buffered by Pallas).
        return pl.BlockSpec((tb, feat), lambda i: (i, 0))

    def resident(shape):
        # Constant index_map -> loaded once, VMEM-resident across the whole grid.
        zeros = (0,) * len(shape)
        return pl.BlockSpec(shape, lambda i, _z=zeros: _z)

    in_specs = [
        stream(P), stream(SA),
        resident((P, H1)), resident((1, H1)),
        resident((H1, E)), resident((1, E)),
        resident((E, H2)), resident((SA, H2)), resident((1, H2)),
        resident((1, H2)), resident((1, 1)),
    ]
    out_specs = pl.BlockSpec((tb, 1), lambda i: (i, 0))

    out = pl.pallas_call(
        _value_fn_kernel,
        grid=grid,
        in_specs=in_specs,
        out_specs=out_specs,
        out_shape=jax.ShapeDtypeStruct((B, 1), jnp.float32),
        compiler_params=pltpu.CompilerParams(
            dimension_semantics=("parallel",),   # shard batch tiles across TCs on v7x
            vmem_limit_bytes=vmem_limit,
        ),
    )(mlp_parameters, sa,
      we1c, be1f, we2c, be2f,
      wv1ec, wv1sac, bv1f,
      wv2c, bv2f)

    return out


def make_params(key, p_dim, emb_hidden, emb_size, s_dim, a_dim, eval_hidden):
    """Deterministic synthetic parameters (Glorot-ish scaling). Biases kept 2D (1, d)."""
    dims = [(p_dim, emb_hidden),                       # embedding net layer 1
            (emb_hidden, emb_size),                    # embedding net layer 2
            (emb_size + s_dim + a_dim, eval_hidden),   # evaluation net hidden layer
            (eval_hidden, 1)]                          # evaluation net output layer
    params = []
    for fan_in, fan_out in dims:
        key, kw, kb = jax.random.split(key, 3)
        scale = (2.0 / (fan_in + fan_out)) ** 0.5
        w = scale * jax.random.normal(kw, (fan_in, fan_out), dtype=jnp.float32)
        b = 0.01 * jax.random.normal(kb, (1, fan_out), dtype=jnp.float32)
        params.extend([w, b])
    return tuple(params)


def _reference(mlp_parameters, states, actions, params):
    """Plain-JAX f32 reference of the module's forward pass."""
    (we1, be1, we2, be2, wv1, bv1, wv2, bv2) = params
    p = mlp_parameters.astype(jnp.float32)
    h = jnp.maximum(p @ we1 + be1, 0.0)
    e = jnp.maximum(h @ we2 + be2, 0.0)
    x = jnp.concatenate([e, states.astype(jnp.float32), actions.astype(jnp.float32)],
                        axis=-1)
    h2 = jnp.maximum(x @ wv1 + bv1, 0.0)
    return h2 @ wv2 + bv2


if __name__ == "__main__":
    key = jax.random.PRNGKey(0)
    k_p, k_s, k_a, k_w = jax.random.split(key, 4)

    B = 2048                     # 4 batch tiles of 512 -> pipelining + megacore sharding
    P_DIM = 48                   # flattened policy (MLP) parameters fed to embedding net
    S_DIM, A_DIM = 12, 4         # state / action dims
    EMB_HIDDEN, EMB_SIZE = 64, 32
    EVAL_HIDDEN = 32             # evaluation_net_hidden_dims = [32]

    mlp_parameters = jax.random.normal(k_p, (B, P_DIM), dtype=jnp.float32)
    states = jax.random.normal(k_s, (B, S_DIM), dtype=jnp.float32)
    actions = jax.random.normal(k_a, (B, A_DIM), dtype=jnp.float32)
    params = make_params(k_w, P_DIM, EMB_HIDDEN, EMB_SIZE, S_DIM, A_DIM, EVAL_HIDDEN)

    ref = _reference(mlp_parameters, states, actions, params)

    # f32 compute path: tight check against the plain-JAX reference.
    out_f32 = policy_conditioned_value(mlp_parameters, states, actions, params,
                                       batch_tile=512, compute_dtype=jnp.float32)
    out_f32 = jax.block_until_ready(out_f32)
    assert out_f32.shape == (B, 1)
    assert jnp.allclose(out_f32, ref, atol=1e-3, rtol=1e-3)

    # bf16 matmul-input path (v6e/v7x fast path, f32 accumulation): loose sanity check.
    out_bf16 = policy_conditioned_value(mlp_parameters, states, actions, params,
                                        batch_tile=512, compute_dtype=jnp.bfloat16)
    out_bf16 = jax.block_until_ready(out_bf16)
    assert out_bf16.shape == (B, 1)
    assert jnp.allclose(out_bf16, ref, atol=1e-1, rtol=1e-1)

    # Ragged batch (B not a multiple of the tile): partial last block is read-padded
    # and write-masked by Pallas -- no wrapper-side jnp.pad pass over the inputs.
    Br = 1000
    out_r = policy_conditioned_value(mlp_parameters[:Br], states[:Br], actions[:Br],
                                     params, batch_tile=512,
                                     compute_dtype=jnp.float32)
    out_r = jax.block_until_ready(out_r)
    assert out_r.shape == (Br, 1)
    assert jnp.allclose(out_r, ref[:Br], atol=1e-3, rtol=1e-3)

    print("KERNEL_OK")
</pallas_src>

<mosaic_0001>
module attributes {stable_mosaic.version = 11 : i64} {
  func.func @_value_fn_kernel(%arg0: i32, %arg1: memref<512x48xf32, #tpu.memory_space<vmem>>, %arg2: memref<512x16xf32, #tpu.memory_space<vmem>>, %arg3: memref<48x64xf32, #tpu.memory_space<vmem>>, %arg4: memref<1x64xf32, #tpu.memory_space<vmem>>, %arg5: memref<64x32xf32, #tpu.memory_space<vmem>>, %arg6: memref<1x32xf32, #tpu.memory_space<vmem>>, %arg7: memref<32x32xf32, #tpu.memory_space<vmem>>, %arg8: memref<16x32xf32, #tpu.memory_space<vmem>>, %arg9: memref<1x32xf32, #tpu.memory_space<vmem>>, %arg10: memref<1x32xf32, #tpu.memory_space<vmem>>, %arg11: memref<1x1xf32, #tpu.memory_space<vmem>>, %arg12: memref<512x1xf32, #tpu.memory_space<vmem>>) attributes {dimension_semantics = [#tpu.dimension_semantics<parallel>], iteration_bounds = array<i64: 4>, scalar_prefetch = 0 : i64, scratch_operands = 0 : i64, tpu.core_type = #tpu.core_type<tc>, window_params = [{transform_indices = @transform_0, window_bounds = array<i64: 512, 48>}, {transform_indices = @transform_1, window_bounds = array<i64: 512, 16>}, {pipeline_mode = #tpu.pipeline_mode<synchronous>, transform_indices = @transform_2, window_bounds = array<i64: 48, 64>}, {pipeline_mode = #tpu.pipeline_mode<synchronous>, transform_indices = @transform_3, window_bounds = array<i64: 1, 64>}, {pipeline_mode = #tpu.pipeline_mode<synchronous>, transform_indices = @transform_4, window_bounds = array<i64: 64, 32>}, {pipeline_mode = #tpu.pipeline_mode<synchronous>, transform_indices = @transform_5, window_bounds = array<i64: 1, 32>}, {pipeline_mode = #tpu.pipeline_mode<synchronous>, transform_indices = @transform_6, window_bounds = array<i64: 32, 32>}, {pipeline_mode = #tpu.pipeline_mode<synchronous>, transform_indices = @transform_7, window_bounds = array<i64: 16, 32>}, {pipeline_mode = #tpu.pipeline_mode<synchronous>, transform_indices = @transform_8, window_bounds = array<i64: 1, 32>}, {pipeline_mode = #tpu.pipeline_mode<synchronous>, transform_indices = @transform_9, window_bounds = array<i64: 1, 32>}, {pipeline_mode = #tpu.pipeline_mode<synchronous>, transform_indices = @transform_10, window_bounds = array<i64: 1, 1>}, {transform_indices = @transform_11, window_bounds = array<i64: 512, 1>}]} {
    %c0 = arith.constant 0 : index
    %c0_0 = arith.constant 0 : index
    %0 = vector.load %arg1[%c0, %c0_0] : memref<512x48xf32, #tpu.memory_space<vmem>>, vector<512x48xf32>
    %c0_1 = arith.constant 0 : index
    %c0_2 = arith.constant 0 : index
    %1 = vector.load %arg2[%c0_1, %c0_2] : memref<512x16xf32, #tpu.memory_space<vmem>>, vector<512x16xf32>
    %c0_3 = arith.constant 0 : index
    %c0_4 = arith.constant 0 : index
    %2 = vector.load %arg3[%c0_3, %c0_4] : memref<48x64xf32, #tpu.memory_space<vmem>>, vector<48x64xf32>
    %cst = arith.constant dense<0.000000e+00> : vector<512x64xf32>
    %3 = tpu.matmul %0, %2, %cst {dimension_numbers = #tpu.dot_dimension_numbers<[1], [0], [0], [1], [0, 0, 1, 1], [], []>} : vector<512x48xf32>, vector<48x64xf32>, vector<512x64xf32> -> vector<512x64xf32>
    %c0_5 = arith.constant 0 : index
    %c0_6 = arith.constant 0 : index
    %4 = vector.load %arg4[%c0_5, %c0_6] : memref<1x64xf32, #tpu.memory_space<vmem>>, vector<1x64xf32>
    %5 = vector.broadcast %4 : vector<1x64xf32> to vector<512x64xf32>
    %6 = arith.addf %3, %5 : vector<512x64xf32>
    %cst_7 = arith.constant 0.000000e+00 : f32
    %7 = vector.broadcast %cst_7 : f32 to vector<512x64xf32>
    %8 = arith.maximumf %6, %7 : vector<512x64xf32>
    %c0_8 = arith.constant 0 : index
    %c0_9 = arith.constant 0 : index
    %9 = vector.load %arg5[%c0_8, %c0_9] : memref<64x32xf32, #tpu.memory_space<vmem>>, vector<64x32xf32>
    %cst_10 = arith.constant dense<0.000000e+00> : vector<512x32xf32>
    %10 = tpu.matmul %8, %9, %cst_10 {dimension_numbers = #tpu.dot_dimension_numbers<[1], [0], [0], [1], [0, 0, 1, 1], [], []>} : vector<512x64xf32>, vector<64x32xf32>, vector<512x32xf32> -> vector<512x32xf32>
    %c0_11 = arith.constant 0 : index
    %c0_12 = arith.constant 0 : index
    %11 = vector.load %arg6[%c0_11, %c0_12] : memref<1x32xf32, #tpu.memory_space<vmem>>, vector<1x32xf32>
    %12 = vector.broadcast %11 : vector<1x32xf32> to vector<512x32xf32>
    %13 = arith.addf %10, %12 : vector<512x32xf32>
    %cst_13 = arith.constant 0.000000e+00 : f32
    %14 = vector.broadcast %cst_13 : f32 to vector<512x32xf32>
    %15 = arith.maximumf %13, %14 : vector<512x32xf32>
    %c0_14 = arith.constant 0 : index
    %c0_15 = arith.constant 0 : index
    %16 = vector.load %arg7[%c0_14, %c0_15] : memref<32x32xf32, #tpu.memory_space<vmem>>, vector<32x32xf32>
    %cst_16 = arith.constant dense<0.000000e+00> : vector<512x32xf32>
    %17 = tpu.matmul %15, %16, %cst_16 {dimension_numbers = #tpu.dot_dimension_numbers<[1], [0], [0], [1], [0, 0, 1, 1], [], []>} : vector<512x32xf32>, vector<32x32xf32>, vector<512x32xf32> -> vector<512x32xf32>
    %c0_17 = arith.constant 0 : index
    %c0_18 = arith.constant 0 : index
    %18 = vector.load %arg8[%c0_17, %c0_18] : memref<16x32xf32, #tpu.memory_space<vmem>>, vector<16x32xf32>
    %cst_19 = arith.constant dense<0.000000e+00> : vector<512x32xf32>
    %19 = tpu.matmul %1, %18, %cst_19 {dimension_numbers = #tpu.dot_dimension_numbers<[1], [0], [0], [1], [0, 0, 1, 1], [], []>} : vector<512x16xf32>, vector<16x32xf32>, vector<512x32xf32> -> vector<512x32xf32>
    %20 = arith.addf %17, %19 : vector<512x32xf32>
    %c0_20 = arith.constant 0 : index
    %c0_21 = arith.constant 0 : index
    %21 = vector.load %arg9[%c0_20, %c0_21] : memref<1x32xf32, #tpu.memory_space<vmem>>, vector<1x32xf32>
    %22 = vector.broadcast %21 : vector<1x32xf32> to vector<512x32xf32>
    %23 = arith.addf %20, %22 : vector<512x32xf32>
    %cst_22 = arith.constant 0.000000e+00 : f32
    %24 = vector.broadcast %cst_22 : f32 to vector<512x32xf32>
    %25 = arith.maximumf %23, %24 : vector<512x32xf32>
    %c0_23 = arith.constant 0 : index
    %c0_24 = arith.constant 0 : index
    %26 = vector.load %arg10[%c0_23, %c0_24] : memref<1x32xf32, #tpu.memory_space<vmem>>, vector<1x32xf32>
    %27 = vector.broadcast %26 : vector<1x32xf32> to vector<512x32xf32>
    %28 = arith.mulf %25, %27 : vector<512x32xf32>
    %cst_25 = arith.constant dense<0.000000e+00> : vector<512xf32>
    %29 = vector.multi_reduction <add>, %28, %cst_25 [1] : vector<512x32xf32> to vector<512xf32>
    %30 = vector.shape_cast %29 : vector<512xf32> to vector<512x1xf32>
    %c0_26 = arith.constant 0 : index
    %c0_27 = arith.constant 0 : index
    %31 = vector.load %arg11[%c0_26, %c0_27] : memref<1x1xf32, #tpu.memory_space<vmem>>, vector<1x1xf32>
    %32 = vector.broadcast %31 : vector<1x1xf32> to vector<512x1xf32>
    %33 = arith.addf %30, %32 : vector<512x1xf32>
    %c0_28 = arith.constant 0 : index
    %c0_29 = arith.constant 0 : index
    %34 = vector.load %arg12[%c0_28, %c0_29] : memref<512x1xf32, #tpu.memory_space<vmem>>, vector<512x1xf32>
    tpu.vector_store %arg12[%c0_28, %c0_29], %33 {strides = array<i32>} : memref<512x1xf32, #tpu.memory_space<vmem>>, vector<512x1xf32>,
    return
  }
  func.func @transform_0(%arg0: i32) -> (i32, i32) {
    %c0_i32 = arith.constant 0 : i32
    %c0_i32_0 = arith.constant 0 : i32
    return %arg0, %c0_i32 : i32, i32
  }
  func.func @transform_1(%arg0: i32) -> (i32, i32) {
    %c0_i32 = arith.constant 0 : i32
    %c0_i32_0 = arith.constant 0 : i32
    return %arg0, %c0_i32 : i32, i32
  }
  func.func @transform_2(%arg0: i32) -> (i32, i32) {
    %c0_i32 = arith.constant 0 : i32
    %c0_i32_0 = arith.constant 0 : i32
    %c0_i32_1 = arith.constant 0 : i32
    return %c0_i32, %c0_i32_0 : i32, i32
  }
  func.func @transform_3(%arg0: i32) -> (i32, i32) {
    %c0_i32 = arith.constant 0 : i32
    %c0_i32_0 = arith.constant 0 : i32
    %c0_i32_1 = arith.constant 0 : i32
    return %c0_i32, %c0_i32_0 : i32, i32
  }
  func.func @transform_4(%arg0: i32) -> (i32, i32) {
    %c0_i32 = arith.constant 0 : i32
    %c0_i32_0 = arith.constant 0 : i32
    %c0_i32_1 = arith.constant 0 : i32
    return %c0_i32, %c0_i32_0 : i32, i32
  }
  func.func @transform_5(%arg0: i32) -> (i32, i32) {
    %c0_i32 = arith.constant 0 : i32
    %c0_i32_0 = arith.constant 0 : i32
    %c0_i32_1 = arith.constant 0 : i32
    return %c0_i32, %c0_i32_0 : i32, i32
  }
  func.func @transform_6(%arg0: i32) -> (i32, i32) {
    %c0_i32 = arith.constant 0 : i32
    %c0_i32_0 = arith.constant 0 : i32
    %c0_i32_1 = arith.constant 0 : i32
    return %c0_i32, %c0_i32_0 : i32, i32
  }
  func.func @transform_7(%arg0: i32) -> (i32, i32) {
    %c0_i32 = arith.constant 0 : i32
    %c0_i32_0 = arith.constant 0 : i32
    %c0_i32_1 = arith.constant 0 : i32
    return %c0_i32, %c0_i32_0 : i32, i32
  }
  func.func @transform_8(%arg0: i32) -> (i32, i32) {
    %c0_i32 = arith.constant 0 : i32
    %c0_i32_0 = arith.constant 0 : i32
    %c0_i32_1 = arith.constant 0 : i32
    return %c0_i32, %c0_i32_0 : i32, i32
  }
  func.func @transform_9(%arg0: i32) -> (i32, i32) {
    %c0_i32 = arith.constant 0 : i32
    %c0_i32_0 = arith.constant 0 : i32
    %c0_i32_1 = arith.constant 0 : i32
    return %c0_i32, %c0_i32_0 : i32, i32
  }
  func.func @transform_10(%arg0: i32) -> (i32, i32) {
    %c0_i32 = arith.constant 0 : i32
    %c0_i32_0 = arith.constant 0 : i32
    %c0_i32_1 = arith.constant 0 : i32
    return %c0_i32, %c0_i32_0 : i32, i32
  }
  func.func @transform_11(%arg0: i32) -> (i32, i32) {
    %c0_i32 = arith.constant 0 : i32
    %c0_i32_0 = arith.constant 0 : i32
    return %arg0, %c0_i32 : i32, i32
  }
}

</mosaic_0001>

<bundles_post_ra>
// kernel: tpu_custom_call.1
= control target key start
LH: loop header
LB: loop body
LE: loop exit
PB: predicated region body
PF: predicated region fallthrough
CT: control target
= control target key end

     0   :  { %s4775_s19 = smov 0   ;;  %s5784_s0 = inlined_call_operand.vmem [shape: f32[2048,48], index: 0, kind: input, shape index: {}]   ;;  %s5785_s1 = inlined_call_operand.vmem [shape: f32[2048,16], index: 1, kind: input, shape index: {}]   ;;  %s5786_s2 = inlined_call_operand.vmem [shape: f32[48,64], index: 2, kind: input, shape index: {}]   ;;  %s5787_s3 = inlined_call_operand.vmem [shape: f32[1,64], index: 3, kind: input, shape index: {}]   ;;  %s5788_s4 = inlined_call_operand.vmem [shape: f32[64,32], index: 4, kind: input, shape index: {}]   ;;  %s5789_s5 = inlined_call_operand.vmem [shape: f32[1,32], index: 5, kind: input, shape index: {}]   ;;  %s5790_s6 = inlined_call_operand.vmem [shape: f32[32,32], index: 6, kind: input, shape index: {}]   ;;  %s5791_s7 = inlined_call_operand.vmem [shape: f32[16,32], index: 7, kind: input, shape index: {}]   ;;  %s5792_s8 = inlined_call_operand.vmem [shape: f32[1,32], index: 8, kind: input, shape index: {}]   ;;  %s5793_s9 = inlined_call_operand.vmem [shape: f32[1,32], index: 9, kind: input, shape index: {}]   ;;  %s5794_s10 = inlined_call_operand.<no memory space> [shape: f32[1,1], index: 10, kind: input, shape index: {}]   ;;  %s5795_s11 = inlined_call_operand.vmem [shape: f32[2048,1], index: 11, kind: output, shape index: {}]  }
   0x1   :  { %v16_v0 = vstv %s5794_s10 }
   0x2   :  { %17 = vst [vmem:[#allocation2] sm:$0x1] %v16_v0 }
   0x3 LB: > { %s3618_s20 = sadd.s32 4294967295, %s4710_s19   ;;  %p3622_p0 = scmp.ge.s32.totalorder %s4710_s19, 1  ;;  %s4710_s19 = sphi %s4775_s19, %s23_s19  }
   0x4   : > { %p351_p1 = scmp.lt.s32.totalorder %s4710_s19, 5 }
   0x6   : > { %p352_p2 = pnand %p3622_p0, %p351_p1 }
   0x7   : > { %v542_v1 = vld [vmem:[%s5786_s2] sm:$0xff] (!%p352_p2)  ;;  %v543_v2 = vld [vmem:[%s5786_s2 + $0x8] sm:$0xff] (!%p352_p2)  ;;  %v544_v3 = vld [vmem:[%s5786_s2 + $0x10] sm:$0xff] (!%p352_p2)  ;;  %s3623_s26 = sshll.u32 (!%p352_p2), %s3618_s20, 6  ;;  %vm555_vm0 = vcmask (!%p352_p2), 392192   ;;  %vm1860_vm1 = vcmask (!%p352_p2), 130048  }
   0x8   : > { %355 = sbr.rel (%p352_p2) target bundleno = 950 (0x3b6), region = 64  ;;  %v4592_v4 = vpack.c.bf16 (!%p352_p2), %v543_v2, %v542_v1  ;;  %v545_v5 = vld [vmem:[%s5786_s2 + $0x18] sm:$0xff] (!%p352_p2)  ;;  %p397_p3 = scmp.lt.s32.totalorder (!%p352_p2), %s3623_s26, 255  ;;  %v546_v7 = vld [vmem:[%s5786_s2 + $0x20] sm:$0xff] (!%p352_p2)  ;;  %v547_v8 = vld [vmem:[%s5786_s2 + $0x28] sm:$0xff] (!%p352_p2)  ;;  %vm1212_vm2 = vcmask (!%p352_p2), 523264  }
   0x9   : > { %v4596_v6 = vpack.c.bf16 (!%p352_p2), %v545_v5, %v544_v3  ;;  %v4600_v9 = vpack.c.bf16 (!%p352_p2), %v547_v8, %v546_v7  ;;  %v1197_v10 = vld [vmem:[%s5788_s4] sm:$0xff] (!%p352_p2)  ;;  %v1198_v11 = vld [vmem:[%s5788_s4 + $0x8] sm:$0xff] (!%p352_p2)  ;;  %v1199_v22 = vld [vmem:[%s5788_s4 + $0x10] sm:$0xff] (!%p352_p2)  ;;  %vm2438_vm3 = vcmask (!%p352_p2), 261120   ;;  %vm3485_vm4 = vcmask (!%p352_p2), 7168  }
   0xa   : > { %4593 = vmatprep.subr.bf16.mxu1 (!%p352_p2), %v4592_v4  ;;  %v4604_v13 = vpack.c.bf16 (!%p352_p2), %v1198_v11, %v1197_v10  ;;  %v1200_v24 = vld [vmem:[%s5788_s4 + $0x18] sm:$0xff] (!%p352_p2)  ;;  %v1201_v27 = vld [vmem:[%s5788_s4 + $0x20] sm:$0xff] (!%p352_p2)  ;;  %v1202_v28 = vld [vmem:[%s5788_s4 + $0x28] sm:$0xff] (!%p352_p2) }
   0xb   : > { %4595 = vmatpush3.bf16.msra.mxu1 (!%p352_p2), %v4592_v4  ;;  %v4608_v26 = vpack.c.bf16 (!%p352_p2), %v1200_v24, %v1199_v22  ;;  %v4612_v29 = vpack.c.bf16 (!%p352_p2), %v1202_v28, %v1201_v27  ;;  %v1203_v30 = vld [vmem:[%s5788_s4 + $0x30] sm:$0xff] (!%p352_p2)  ;;  %v1204_v31 = vld [vmem:[%s5788_s4 + $0x38] sm:$0xff] (!%p352_p2)  ;;  %v1858_v22 = vld [vmem:[%s5791_s7] sm:$0xff] (!%p352_p2) }
   0xc   : > { %4597 = vmatprep.subr.bf16.mxu1 (!%p352_p2), %v4596_v6  ;;  %v4616_v34 = vpack.c.bf16 (!%p352_p2), %v1204_v31, %v1203_v30  ;;  %v1854_v27 = vld [vmem:[%s5790_s6] sm:$0xff] (!%p352_p2)  ;;  %v1855_v28 = vld [vmem:[%s5790_s6 + $0x8] sm:$0xff] (!%p352_p2) }
   0xd   : > { %v4624_v30 = vpack.c.bf16 (!%p352_p2), %v1855_v28, %v1854_v27 }
   0xf   : > { %s5797_s26 = smov (!%p397_p3, %s3623_s26), 255  ;;  %4599 = vmatpush3.bf16.msra.mxu1 %v4596_v6 }
  0x10   : > { %s4801_s14 = sshll.u32 %s5797_s26, 3  ;;  %4601 = vmatprep.subr.bf16.mxu1 %v4600_v9 }
  0x11   : > { %s4807_s17 = scalar_lea.vmem %s5784_s0, %s4801_s14  ;;  %s4971_s23 = scalar_lea.vmem %s5785_s1, %s4801_s14 }
  0x12   : > { %v414_v12 = vld [vmem:[%s4807_s17] sm:$0xff]  ;;  %v415_v14 = vld [vmem:[%s4807_s17 + $0x8] sm:$0xff]  ;;  %v416_v15 = vld [vmem:[%s4807_s17 + $0x10] sm:$0xff] }
  0x13   : > { %4180 = vmatprep.mubr.msk.f32.mxu1 %vm555_vm0, %v414_v12  ;;  %4603 = vmatpush3.bf16.msra.mxu1 %v4600_v9  ;;  %v417_v16 = vld [vmem:[%s4807_s17 + $0x18] sm:$0xff]  ;;  %v418_v17 = vld [vmem:[%s4807_s17 + $0x20] sm:$0xff]  ;;  %v419_v18 = vld [vmem:[%s4807_s17 + $0x28] sm:$0xff] }
  0x14   : > { %4605 = vmatprep.subr.bf16.mxu1 %v4604_v13  ;;  %v420_v19 = vld [vmem:[%s4807_s17 + $0x30] sm:$0xff]  ;;  %v421_v20 = vld [vmem:[%s4807_s17 + $0x38] sm:$0xff]  ;;  %v422_v21 = vld [vmem:[%s4807_s17 + $0x40] sm:$0xff] }
  0x15   : > { %v423_v23 = vld [vmem:[%s4807_s17 + $0x48] sm:$0xff]  ;;  %v424_v25 = vld [vmem:[%s4807_s17 + $0x50] sm:$0xff]  ;;  %v425_v32 = vld [vmem:[%s4807_s17 + $0x58] sm:$0xff] }
  0x16   : > { %4181 = vmatmul.mubr.msk.f32.vlgmr.msra.gmra.mrb[0].mxu1 %vm555_vm0, %v415_v14  ;;  %v426_v33 = vld [vmem:[%s4807_s17 + $0x60] sm:$0xff]  ;;  %v427_v35 = vld [vmem:[%s4807_s17 + $0x68] sm:$0xff]  ;;  %v428_v36 = vld [vmem:[%s4807_s17 + $0x70] sm:$0xff] }
  0x17   : > { %4183 = vmatprep.mubr.msk.f32.mxu1 %vm555_vm0, %v416_v15  ;;  %4607 = vmatpush3.bf16.msra.mxu1 %v4604_v13  ;;  %v429_v37 = vld [vmem:[%s4807_s17 + $0x78] sm:$0xff]  ;;  %v430_v38 = vld [vmem:[%s4807_s17 + $0x80] sm:$0xff]  ;;  %v431_v39 = vld [vmem:[%s4807_s17 + $0x88] sm:$0xff] }
  0x18   : > { %4609 = vmatprep.subr.bf16.mxu1 %v4608_v26  ;;  %v432_v40 = vld [vmem:[%s4807_s17 + $0x90] sm:$0xff]  ;;  %v433_v41 = vld [vmem:[%s4807_s17 + $0x98] sm:$0xff]  ;;  %v434_v42 = vld [vmem:[%s4807_s17 + $0xa0] sm:$0xff] }
  0x19   : > { %v435_v43 = vld [vmem:[%s4807_s17 + $0xa8] sm:$0xff]  ;;  %v436_v44 = vld [vmem:[%s4807_s17 + $0xb0] sm:$0xff]  ;;  %v437_v45 = vld [vmem:[%s4807_s17 + $0xb8] sm:$0xff] }
  0x1a   : > { %4184 = vmatmul.mubr.msk.f32.gmra.mrb[2].mxu1 %vm555_vm0, %v417_v16  ;;  %v438_v46 = vld [vmem:[%s4807_s17 + $0xc0] sm:$0xff]  ;;  %v439_v47 = vld [vmem:[%s4807_s17 + $0xc8] sm:$0xff]  ;;  %v440_v48 = vld [vmem:[%s4807_s17 + $0xd0] sm:$0xff] }
  0x1b   : > { %4186 = vmatprep.mubr.msk.f32.mxu1 %vm555_vm0, %v418_v17  ;;  %4611 = vmatpush3.bf16.msra.mxu1 %v4608_v26  ;;  %v441_v49 = vld [vmem:[%s4807_s17 + $0xd8] sm:$0xff]  ;;  %v442_v50 = vld [vmem:[%s4807_s17 + $0xe0] sm:$0xff]  ;;  %v443_v51 = vld [vmem:[%s4807_s17 + $0xe8] sm:$0xff] }
  0x1c   : > { %4613 = vmatprep.subr.bf16.mxu1 %v4612_v29  ;;  %v444_v52 = vld [vmem:[%s4807_s17 + $0xf0] sm:$0xff]  ;;  %v445_v53 = vld [vmem:[%s4807_s17 + $0xf8] sm:$0xff]  ;;  %v446_v54 = vld [vmem:[%s4807_s17 + $0x100] sm:$0xff] }
  0x1d   : > { %v447_v55 = vld [vmem:[%s4807_s17 + $0x108] sm:$0xff]  ;;  %v448_v56 = vld [vmem:[%s4807_s17 + $0x110] sm:$0xff]  ;;  %v449_v57 = vld [vmem:[%s4807_s17 + $0x118] sm:$0xff] }
  0x1e   : > { %4187 = vmatmul.mubr.msk.f32.gmra.mrb[4].mxu1 %vm555_vm0, %v419_v18  ;;  %v450_v58 = vld [vmem:[%s4807_s17 + $0x120] sm:$0xff]  ;;  %v451_v59 = vld [vmem:[%s4807_s17 + $0x128] sm:$0xff]  ;;  %v452_v60 = vld [vmem:[%s4807_s17 + $0x130] sm:$0xff] }
  0x1f   : > { %4189 = vmatprep.mubr.msk.f32.mxu1 %vm555_vm0, %v420_v19  ;;  %4615 = vmatpush3.bf16.msra.mxu1 %v4612_v29  ;;  %v453_v61 = vld [vmem:[%s4807_s17 + $0x138] sm:$0xff]  ;;  %v454_v62 = vld [vmem:[%s4807_s17 + $0x140] sm:$0xff]  ;;  %v455_v63 = vld [vmem:[%s4807_s17 + $0x148] sm:$0xff] }
  0x20   : > { %4617 = vmatprep.subr.bf16.mxu1 %v4616_v34  ;;  %v456_v0 = vld [vmem:[%s4807_s17 + $0x150] sm:$0xff]  ;;  %v457_v1 = vld [vmem:[%s4807_s17 + $0x158] sm:$0xff]  ;;  %v458_v2 = vld [vmem:[%s4807_s17 + $0x160] sm:$0xff] }
  0x21   : > { %v459_v3 = vld [vmem:[%s4807_s17 + $0x168] sm:$0xff]  ;;  %v460_v4 = vld [vmem:[%s4807_s17 + $0x170] sm:$0xff]  ;;  %v461_v5 = vld [vmem:[%s4807_s17 + $0x178] sm:$0xff] }
  0x22   : > { %4190 = vmatmul.mubr.msk.f32.gmra.mrb[6].mxu1 %vm555_vm0, %v421_v20  ;;  %v462_v6 = vld [vmem:[%s4807_s17 + $0x180] sm:$0xff]  ;;  %v463_v7 = vld [vmem:[%s4807_s17 + $0x188] sm:$0xff]  ;;  %v464_v8 = vld [vmem:[%s4807_s17 + $0x190] sm:$0xff] }
  0x23   : > { %4192 = vmatprep.mubr.msk.f32.mxu1 %vm555_vm0, %v422_v21  ;;  %4619 = vmatpush3.bf16.msra.mxu1 %v4616_v34  ;;  %v465_v9 = vld [vmem:[%s4807_s17 + $0x198] sm:$0xff]  ;;  %v466_v10 = vld [vmem:[%s4807_s17 + $0x1a0] sm:$0xff]  ;;  %v467_v11 = vld [vmem:[%s4807_s17 + $0x1a8] sm:$0xff] }
  0x24   : > { %v468_v12 = vld [vmem:[%s4807_s17 + $0x1b0] sm:$0xff]  ;;  %v469_v13 = vld [vmem:[%s4807_s17 + $0x1b8] sm:$0xff]  ;;  %v470_v14 = vld [vmem:[%s4807_s17 + $0x1c0] sm:$0xff] }
  0x25   : > { %v471_v15 = vld [vmem:[%s4807_s17 + $0x1c8] sm:$0xff]  ;;  %v472_v16 = vld [vmem:[%s4807_s17 + $0x1d0] sm:$0xff]  ;;  %v473_v17 = vld [vmem:[%s4807_s17 + $0x1d8] sm:$0xff] }
  0x26   : > { %4193 = vmatmul.mubr.msk.f32.gmra.mrb[8].mxu1 %vm555_vm0, %v423_v23  ;;  %v474_v18 = vld [vmem:[%s4807_s17 + $0x1e0] sm:$0xff]  ;;  %v475_v19 = vld [vmem:[%s4807_s17 + $0x1e8] sm:$0xff]  ;;  %v476_v20 = vld [vmem:[%s4807_s17 + $0x1f0] sm:$0xff] }
  0x27   : > { %4195 = vmatprep.mubr.msk.f32.mxu1 %vm555_vm0, %v424_v25  ;;  %v477_v21 = vld [vmem:[%s4807_s17 + $0x1f8] sm:$0xff]  ;;  %v1859_v23 = vld [vmem:[%s5791_s7 + $0x8] sm:$0xff]  ;;  %v478_v25 = vld [vmem:[%s4971_s23] sm:$0xff]  ;;  %s5587_s17 = scalar_lea.vmem %s5795_s11, %s4801_s14 }
  0x28   : > { %v4620_v24 = vpack.c.bf16 %v1859_v23, %v1858_v22  ;;  %4392 = vmatprep.mubr.msk.f32.mxu0 %vm1860_vm1, %v478_v25  ;;  %v479_v26 = vld [vmem:[%s4971_s23 + $0x8] sm:$0xff]  ;;  %v480_v29 = vld [vmem:[%s4971_s23 + $0x10] sm:$0xff]  ;;  %v481_v31 = vld [vmem:[%s4971_s23 + $0x18] sm:$0xff] }
  0x29   : > { %v484_v34 = vld [vmem:[%s4971_s23 + $0x30] sm:$0xff]  ;;  %v505_v23 = vld [vmem:[%s4971_s23 + $0xd8] sm:$0xff]  ;;  %v506_v25 = vld [vmem:[%s4971_s23 + $0xe0] sm:$0xff] }
  0x2a   : > { %4196 = vmatmul.mubr.msk.f32.gmra.mrb[10].mxu1 %vm555_vm0, %v425_v32  ;;  %4621 = vmatprep.subr.bf16.mxu0 %v4620_v24  ;;  %v482_v32 = vld [vmem:[%s4971_s23 + $0x20] sm:$0xff] }
  0x2b   : > { %4198 = vmatprep.mubr.msk.f32.mxu1 %vm555_vm0, %v426_v33  ;;  %4623 = vmatpush3.bf16.msra.mxu0 %v4620_v24  ;;  %v483_v33 = vld [vmem:[%s4971_s23 + $0x28] sm:$0xff] }
  0x2c   : > { %4625 = vmatprep.subr.bf16.mxu0 %v4624_v30 }
  0x2e   : > { %4199 = vmatmul.mubr.msk.f32.gmra.mrb[12].mxu1 %vm555_vm0, %v427_v35  ;;  %4393 = vmatmul.mubr.msk.f32.vlgmr.msra.gmra.mrb[0].mxu0 %vm1860_vm1, %v479_v26  ;;  %v485_v35 = vld [vmem:[%s4971_s23 + $0x38] sm:$0xff] }
  0x2f   : > { %4201 = vmatprep.mubr.msk.f32.mxu1 %vm555_vm0, %v428_v36  ;;  %4395 = vmatprep.mubr.msk.f32.mxu0 %vm1860_vm1, %v480_v29  ;;  %v486_v36 = vld [vmem:[%s4971_s23 + $0x40] sm:$0xff] }
  0x30   : > { %4627 = vmatpush3.bf16.msra.mxu0 %v4624_v30 }
  0x32   : > { %4202 = vmatmul.mubr.msk.f32.gmra.mrb[14].mxu1 %vm555_vm0, %v429_v37  ;;  %4396 = vmatmul.mubr.msk.f32.gmra.mrb[2].mxu0 %vm1860_vm1, %v481_v31  ;;  %v487_v37 = vld [vmem:[%s4971_s23 + $0x48] sm:$0xff] }
  0x33   : > { %4204 = vmatprep.mubr.msk.f32.mxu1 %vm555_vm0, %v430_v38  ;;  %4398 = vmatprep.mubr.msk.f32.mxu0 %vm1860_vm1, %v482_v32  ;;  %v488_v38 = vld [vmem:[%s4971_s23 + $0x50] sm:$0xff]  ;;  %v507_v31 = vld [vmem:[%s4971_s23 + $0xe8] sm:$0xff] }
  0x36   : > { %4205 = vmatmul.mubr.msk.f32.gmra.mrb[16].mxu1 %vm555_vm0, %v431_v39  ;;  %4399 = vmatmul.mubr.msk.f32.gmra.mrb[4].mxu0 %vm1860_vm1, %v483_v33  ;;  %v489_v39 = vld [vmem:[%s4971_s23 + $0x58] sm:$0xff]  ;;  %v508_v33 = vld [vmem:[%s4971_s23 + $0xf0] sm:$0xff] }
  0x37   : > { %4207 = vmatprep.mubr.msk.f32.mxu1 %vm555_vm0, %v432_v40  ;;  %4401 = vmatprep.mubr.msk.f32.mxu0 %vm1860_vm1, %v484_v34  ;;  %v490_v40 = vld [vmem:[%s4971_s23 + $0x60] sm:$0xff] }
  0x3a   : > { %4208 = vmatmul.mubr.msk.f32.gmra.mrb[18].mxu1 %vm555_vm0, %v433_v41  ;;  %4402 = vmatmul.mubr.msk.f32.gmra.mrb[6].mxu0 %vm1860_vm1, %v485_v35  ;;  %v491_v41 = vld [vmem:[%s4971_s23 + $0x68] sm:$0xff] }
  0x3b   : > { %4210 = vmatprep.mubr.msk.f32.mxu1 %vm555_vm0, %v434_v42  ;;  %4404 = vmatprep.mubr.msk.f32.mxu0 %vm1860_vm1, %v486_v36  ;;  %v492_v42 = vld [vmem:[%s4971_s23 + $0x70] sm:$0xff] }
  0x3e   : > { %4211 = vmatmul.mubr.msk.f32.gmra.mrb[20].mxu1 %vm555_vm0, %v435_v43  ;;  %4405 = vmatmul.mubr.msk.f32.gmra.mrb[8].mxu0 %vm1860_vm1, %v487_v37  ;;  %v493_v43 = vld [vmem:[%s4971_s23 + $0x78] sm:$0xff] }
  0x3f   : > { %4213 = vmatprep.mubr.msk.f32.mxu1 %vm555_vm0, %v436_v44  ;;  %4407 = vmatprep.mubr.msk.f32.mxu0 %vm1860_vm1, %v488_v38  ;;  %v5014_v44 = vld [vmem:[%s5787_s3] ss:$0 sm:$0xff] }
  0x42   : > { %4214 = vmatmul.mubr.msk.f32.gmra.mrb[22].mxu1 %vm555_vm0, %v437_v45  ;;  %4408 = vmatmul.mubr.msk.f32.gmra.mrb[10].mxu0 %vm1860_vm1, %v489_v39  ;;  %v494_v45 = vld [vmem:[%s4971_s23 + $0x80] sm:$0xff]  ;;  %v509_v39 = vld [vmem:[%s4971_s23 + $0xf8] sm:$0xff] }
  0x43   : > { %4216 = vmatprep.mubr.msk.f32.mxu1 %vm555_vm0, %v438_v46  ;;  %4410 = vmatprep.mubr.msk.f32.mxu0 %vm1860_vm1, %v490_v40 }
  0x46   : > { %4217 = vmatmul.mubr.msk.f32.gmra.mrb[24].mxu1 %vm555_vm0, %v439_v47  ;;  %4411 = vmatmul.mubr.msk.f32.gmra.mrb[12].mxu0 %vm1860_vm1, %v491_v41  ;;  %v495_v47 = vld [vmem:[%s4971_s23 + $0x88] sm:$0xff]  ;;  %v510_v41 = vld [vmem:[%s4971_s23 + $0x100] sm:$0xff] }
  0x47   : > { %4219 = vmatprep.mubr.msk.f32.mxu1 %vm555_vm0, %v440_v48  ;;  %4413 = vmatprep.mubr.msk.f32.mxu0 %vm1860_vm1, %v492_v42 }
  0x4a   : > { %4220 = vmatmul.mubr.msk.f32.gmra.mrb[26].mxu1 %vm555_vm0, %v441_v49  ;;  %4414 = vmatmul.mubr.msk.f32.gmra.mrb[14].mxu0 %vm1860_vm1, %v493_v43 }
  0x4b   : > { %4222 = vmatprep.mubr.msk.f32.mxu1 %vm555_vm0, %v442_v50  ;;  %4416 = vmatprep.mubr.msk.f32.mxu0 %vm1860_vm1, %v494_v45 }
  0x4e   : > { %4223 = vmatmul.mubr.msk.f32.gmra.mrb[28].mxu1 %vm555_vm0, %v443_v51  ;;  %4417 = vmatmul.mubr.msk.f32.gmra.mrb[16].mxu0 %vm1860_vm1, %v495_v47  ;;  %v496_v51 = vld [vmem:[%s4971_s23 + $0x90] sm:$0xff] }
  0x4f   : > { %4225 = vmatprep.mubr.msk.f32.mxu1 %vm555_vm0, %v444_v52  ;;  %v497_v52 = vld [vmem:[%s4971_s23 + $0x98] sm:$0xff]  ;;  %4419 = vmatprep.mubr.msk.f32.mxu0 %vm1860_vm1, %v496_v51 }
  0x52   : > { %4226 = vmatmul.mubr.msk.f32.gmra.mrb[30].mxu1 %vm555_vm0, %v445_v53  ;;  %v498_v53 = vld [vmem:[%s4971_s23 + $0xa0] sm:$0xff]  ;;  %4420 = vmatmul.mubr.msk.f32.gmra.mrb[18].mxu0 %vm1860_vm1, %v497_v52 }
  0x53   : > { %4228 = vmatprep.mubr.msk.f32.mxu1 %vm555_vm0, %v446_v54  ;;  %4422 = vmatprep.mubr.msk.f32.mxu0 %vm1860_vm1, %v498_v53 }
  0x56   : > { %4229 = vmatmul.mubr.msk.f32.gmra.mrb[32].mxu1 %vm555_vm0, %v447_v55 }
  0x57   : > { %4231 = vmatprep.mubr.msk.f32.mxu1 %vm555_vm0, %v448_v56 }
  0x5a   : > { %4232 = vmatmul.mubr.msk.f32.gmra.mrb[34].mxu1 %vm555_vm0, %v449_v57 }
  0x5b   : > { %4234 = vmatprep.mubr.msk.f32.mxu1 %vm555_vm0, %v450_v58 }
  0x5e   : > { %4235 = vmatmul.mubr.msk.f32.gmra.mrb[36].mxu1 %vm555_vm0, %v451_v59 }
  0x5f   : > { %4237 = vmatprep.mubr.msk.f32.mxu1 %vm555_vm0, %v452_v60  ;;  %v499_v60 = vld [vmem:[%s4971_s23 + $0xa8] sm:$0xff] }
  0x60   : > { %4423 = vmatmul.mubr.msk.f32.gmra.mrb[20].mxu0 %vm1860_vm1, %v499_v60 }
  0x62   : > { %4238 = vmatmul.mubr.msk.f32.gmra.mrb[38].mxu1 %vm555_vm0, %v453_v61  ;;  %v500_v61 = vld [vmem:[%s4971_s23 + $0xb0] sm:$0xff] }
  0x63   : > { %4240 = vmatprep.mubr.msk.f32.mxu1 %vm555_vm0, %v454_v62  ;;  %4425 = vmatprep.mubr.msk.f32.mxu0 %vm1860_vm1, %v500_v61 }
  0x66   : > { %4241 = vmatmul.mubr.msk.f32.gmra.mrb[40].mxu1 %vm555_vm0, %v455_v63 }
  0x67   : > { %4243 = vmatprep.mubr.msk.f32.mxu1 %vm555_vm0, %v456_v0  ;;  %v1856_v0 = vld [vmem:[%s5790_s6 + $0x10] sm:$0xff] }
  0x6a   : > { %4244 = vmatmul.mubr.msk.f32.gmra.mrb[42].mxu1 %vm555_vm0, %v457_v1  ;;  %v1857_v1 = vld [vmem:[%s5790_s6 + $0x18] sm:$0xff] }
  0x6b   : > { %4246 = vmatprep.mubr.msk.f32.mxu1 %vm555_vm0, %v458_v2 }
  0x6e   : > { %4247 = vmatmul.mubr.msk.f32.gmra.mrb[44].mxu1 %vm555_vm0, %v459_v3 }
  0x6f   : > { %4249 = vmatprep.mubr.msk.f32.mxu1 %vm555_vm0, %v460_v4 }
  0x72   : > { %4250 = vmatmul.mubr.msk.f32.gmra.mrb[46].mxu1 %vm555_vm0, %v461_v5  ;;  %v4628_v5 = vpack.c.bf16 %v1857_v1, %v1856_v0  ;;  %v515_v0 = vld [vmem:[%s4971_s23 + $0x128] sm:$0xff] }
  0x73   : > { %4252 = vmatprep.mubr.msk.f32.mxu1 %vm555_vm0, %v462_v6 }
  0x74   : > { %4629 = vmatprep.subr.bf16.mxu0 %v4628_v5 }
  0x75   : > { %4631 = vmatpush3.bf16.msra.mxu0 %v4628_v5 }
  0x76   : > { %4253 = vmatmul.mubr.msk.f32.gmra.mrb[48].mxu1 %vm555_vm0, %v463_v7  ;;  %v501_v7 = vld [vmem:[%s4971_s23 + $0xb8] sm:$0xff] }
  0x77   : > { %4255 = vmatprep.mubr.msk.f32.mxu1 %vm555_vm0, %v464_v8  ;;  %4426 = vmatmul.mubr.msk.f32.gmra.mrb[22].mxu0 %vm1860_vm1, %v501_v7 }
  0x7a   : > { %4256 = vmatmul.mubr.msk.f32.gmra.mrb[50].mxu1 %vm555_vm0, %v465_v9  ;;  %v502_v9 = vld [vmem:[%s4971_s23 + $0xc0] sm:$0xff] }
  0x7b   : > { %4258 = vmatprep.mubr.msk.f32.mxu1 %vm555_vm0, %v466_v10  ;;  %4428 = vmatprep.mubr.msk.f32.mxu0 %vm1860_vm1, %v502_v9 }
  0x7e   : > { %4259 = vmatmul.mubr.msk.f32.gmra.mrb[52].mxu1 %vm555_vm0, %v467_v11 }
  0x7f   : > { %4261 = vmatprep.mubr.msk.f32.mxu1 %vm555_vm0, %v468_v12 }
  0x82   : > { %4262 = vmatmul.mubr.msk.f32.gmra.mrb[54].mxu1 %vm555_vm0, %v469_v13 }
  0x83   : > { %4264 = vmatprep.mubr.msk.f32.mxu1 %vm555_vm0, %v470_v14 }
  0x86   : > { %4265 = vmatmul.mubr.msk.f32.gmra.mrb[56].mxu1 %vm555_vm0, %v471_v15  ;;  %v503_v15 = vld [vmem:[%s4971_s23 + $0xc8] sm:$0xff] }
  0x87   : > { %4267 = vmatprep.mubr.msk.f32.mxu1 %vm555_vm0, %v472_v16  ;;  %4429 = vmatmul.mubr.msk.f32.gmra.mrb[24].mxu0 %vm1860_vm1, %v503_v15 }
  0x8a   : > { %4268 = vmatmul.mubr.msk.f32.gmra.mrb[58].mxu1 %vm555_vm0, %v473_v17  ;;  %v504_v17 = vld [vmem:[%s4971_s23 + $0xd0] sm:$0xff] }
  0x8b   : > { %4270 = vmatprep.mubr.msk.f32.mxu1 %vm555_vm0, %v474_v18  ;;  %4431 = vmatprep.mubr.msk.f32.mxu0 %vm1860_vm1, %v504_v17 }
  0x8c   : > { %4432 = vmatmul.mubr.msk.f32.gmra.mrb[26].mxu0 %vm1860_vm1, %v505_v23 }
  0x8d   : > { %4434 = vmatprep.mubr.msk.f32.mxu0 %vm1860_vm1, %v506_v25 }
  0x8e   : > { %4271 = vmatmul.mubr.msk.f32.gmra.mrb[60].mxu1 %vm555_vm0, %v475_v19 }
  0x8f   : > { %4273 = vmatprep.mubr.msk.f32.mxu1 %vm555_vm0, %v476_v20 }
  0x90   : > { %4435 = vmatmul.mubr.msk.f32.gmra.mrb[28].mxu0 %vm1860_vm1, %v507_v31 }
  0x91   : > { %4437 = vmatprep.mubr.msk.f32.mxu0 %vm1860_vm1, %v508_v33 }
  0x92   : > { %4274 = vmatmul.mubr.msk.f32.gmra.mrb[62].mxu1 %vm555_vm0, %v477_v21 }
  0x94   : > { %4438 = vmatmul.mubr.msk.f32.gmra.mrb[30].mxu0 %vm1860_vm1, %v509_v39 }
  0x95   : > { %4440 = vmatprep.mubr.msk.f32.mxu0 %vm1860_vm1, %v510_v41 }
  0xe9   : > { %v4182_v46 = vpop.f32.mrb[0].mxu1 }
  0xea   : > { %v820_v48 = vadd.f32 %v4182_v46, %v5014_v44  ;;  %v814_v49 = vpop.f32.mrb[1].mxu1 }
  0xeb   : > { %v815_v50 = vadd.f32 %v5014_v44, %v814_v49 }
  0xec   : > { %v1134_v56 = vmax.f32 %v820_v48, 0.0  ;;  %v511_v48 = vld [vmem:[%s4971_s23 + $0x108] sm:$0xff] }
  0xed   : > { %v1133_v54 = vmax.f32 %v815_v50, 0.0  ;;  %v4185_v55 = vpop.f32.mrb[2].mxu1  ;;  %v512_v50 = vld [vmem:[%s4971_s23 + $0x110] sm:$0xff]  ;;  %4441 = vmatmul.mubr.msk.f32.gmra.mrb[32].mxu0 %vm1860_vm1, %v511_v48 }
  0xee   : > { %v830_v57 = vadd.f32 %v4185_v55, %v5014_v44  ;;  %v824_v58 = vpop.f32.mrb[3].mxu1  ;;  %4443 = vmatprep.mubr.msk.f32.mxu0 %vm1860_vm1, %v512_v50 }
  0xef   : > { %v825_v59 = vadd.f32 %v5014_v44, %v824_v58  ;;  %4292 = vmatprep.mubr.msk.f32.mxu1 %vm1212_vm2, %v1133_v54  ;;  %v514_v58 = vld [vmem:[%s4971_s23 + $0x120] sm:$0xff] }
  0xf0   : > { %4293 = vmatmul.mubr.msk.f32.vlgmr.msra.gmra.mrb[64].mxu1 %vm1212_vm2, %v1134_v56  ;;  %v1136_v2 = vmax.f32 %v830_v57, 0.0  ;;  %v513_v56 = vld [vmem:[%s4971_s23 + $0x118] sm:$0xff] }
  0xf1   : > { %v1135_v62 = vmax.f32 %v825_v59, 0.0  ;;  %v4188_v63 = vpop.f32.mrb[4].mxu1  ;;  %4444 = vmatmul.mubr.msk.f32.gmra.mrb[34].mxu0 %vm1860_vm1, %v513_v56 }
  0xf2   : > { %v840_v3 = vadd.f32 %v4188_v63, %v5014_v44  ;;  %v834_v4 = vpop.f32.mrb[5].mxu1  ;;  %4446 = vmatprep.mubr.msk.f32.mxu0 %vm1860_vm1, %v514_v58 }
  0xf3   : > { %v835_v6 = vadd.f32 %v5014_v44, %v834_v4  ;;  %4295 = vmatprep.mubr.msk.f32.mxu1 %vm1212_vm2, %v1135_v62 }
  0xf4   : > { %v1138_v8 = vmax.f32 %v840_v3, 0.0  ;;  %4296 = vmatmul.mubr.msk.f32.gmra.mrb[66].mxu1 %vm1212_vm2, %v1136_v2  ;;  %v516_v2 = vld [vmem:[%s4971_s23 + $0x130] sm:$0xff] }
  0xf5   : > { %v1137_v10 = vmax.f32 %v835_v6, 0.0  ;;  %v4191_v11 = vpop.f32.mrb[6].mxu1  ;;  %4447 = vmatmul.mubr.msk.f32.gmra.mrb[36].mxu0 %vm1860_vm1, %v515_v0 }
  0xf6   : > { %v850_v12 = vadd.f32 %v4191_v11, %v5014_v44  ;;  %v844_v13 = vpop.f32.mrb[7].mxu1  ;;  %4449 = vmatprep.mubr.msk.f32.mxu0 %vm1860_vm1, %v516_v2 }
  0xf7   : > { %v845_v14 = vadd.f32 %v5014_v44, %v844_v13  ;;  %4298 = vmatprep.mubr.msk.f32.mxu1 %vm1212_vm2, %v1137_v10  ;;  %v518_v10 = vld [vmem:[%s4971_s23 + $0x140] sm:$0xff] }
  0xf8   : > { %v1140_v16 = vmax.f32 %v850_v12, 0.0  ;;  %4299 = vmatmul.mubr.msk.f32.gmra.mrb[68].mxu1 %vm1212_vm2, %v1138_v8  ;;  %v517_v8 = vld [vmem:[%s4971_s23 + $0x138] sm:$0xff] }
  0xf9   : > { %v1139_v18 = vmax.f32 %v845_v14, 0.0  ;;  %v4194_v19 = vpop.f32.mrb[8].mxu1  ;;  %4450 = vmatmul.mubr.msk.f32.gmra.mrb[38].mxu0 %vm1860_vm1, %v517_v8 }
  0xfa   : > { %v860_v20 = vadd.f32 %v4194_v19, %v5014_v44  ;;  %v854_v21 = vpop.f32.mrb[9].mxu1  ;;  %4452 = vmatprep.mubr.msk.f32.mxu0 %vm1860_vm1, %v518_v10 }
  0xfb   : > { %v855_v22 = vadd.f32 %v5014_v44, %v854_v21  ;;  %4301 = vmatprep.mubr.msk.f32.mxu1 %vm1212_vm2, %v1139_v18  ;;  %v520_v18 = vld [vmem:[%s4971_s23 + $0x150] sm:$0xff] }
  0xfc   : > { %v1142_v24 = vmax.f32 %v860_v20, 0.0  ;;  %4302 = vmatmul.mubr.msk.f32.gmra.mrb[70].mxu1 %vm1212_vm2, %v1140_v16  ;;  %v519_v16 = vld [vmem:[%s4971_s23 + $0x148] sm:$0xff] }
  0xfd   : > { %v1141_v26 = vmax.f32 %v855_v22, 0.0  ;;  %v4197_v27 = vpop.f32.mrb[10].mxu1  ;;  %4453 = vmatmul.mubr.msk.f32.gmra.mrb[40].mxu0 %vm1860_vm1, %v519_v16 }
  0xfe   : > { %v870_v28 = vadd.f32 %v4197_v27, %v5014_v44  ;;  %v864_v29 = vpop.f32.mrb[11].mxu1  ;;  %4455 = vmatprep.mubr.msk.f32.mxu0 %vm1860_vm1, %v520_v18 }
  0xff   : > { %v865_v30 = vadd.f32 %v5014_v44, %v864_v29  ;;  %4304 = vmatprep.mubr.msk.f32.mxu1 %vm1212_vm2, %v1141_v26  ;;  %v522_v26 = vld [vmem:[%s4971_s23 + $0x160] sm:$0xff] }
 0x100   : > { %v1144_v32 = vmax.f32 %v870_v28, 0.0  ;;  %4305 = vmatmul.mubr.msk.f32.gmra.mrb[72].mxu1 %vm1212_vm2, %v1142_v24  ;;  %v521_v24 = vld [vmem:[%s4971_s23 + $0x158] sm:$0xff] }
 0x101   : > { %v1143_v34 = vmax.f32 %v865_v30, 0.0  ;;  %v4200_v35 = vpop.f32.mrb[12].mxu1  ;;  %4456 = vmatmul.mubr.msk.f32.gmra.mrb[42].mxu0 %vm1860_vm1, %v521_v24 }
 0x102   : > { %v880_v36 = vadd.f32 %v4200_v35, %v5014_v44  ;;  %v874_v37 = vpop.f32.mrb[13].mxu1  ;;  %4458 = vmatprep.mubr.msk.f32.mxu0 %vm1860_vm1, %v522_v26 }
 0x103   : > { %v875_v38 = vadd.f32 %v5014_v44, %v874_v37  ;;  %4307 = vmatprep.mubr.msk.f32.mxu1 %vm1212_vm2, %v1143_v34  ;;  %v524_v34 = vld [vmem:[%s4971_s23 + $0x170] sm:$0xff] }
 0x104   : > { %v1146_v40 = vmax.f32 %v880_v36, 0.0  ;;  %4308 = vmatmul.mubr.msk.f32.gmra.mrb[74].mxu1 %vm1212_vm2, %v1144_v32  ;;  %v523_v32 = vld [vmem:[%s4971_s23 + $0x168] sm:$0xff] }
 0x105   : > { %v1145_v42 = vmax.f32 %v875_v38, 0.0  ;;  %v4203_v43 = vpop.f32.mrb[14].mxu1  ;;  %4459 = vmatmul.mubr.msk.f32.gmra.mrb[44].mxu0 %vm1860_vm1, %v523_v32 }
 0x106   : > { %v890_v45 = vadd.f32 %v4203_v43, %v5014_v44  ;;  %v884_v46 = vpop.f32.mrb[15].mxu1  ;;  %4461 = vmatprep.mubr.msk.f32.mxu0 %vm1860_vm1, %v524_v34 }
 0x107   : > { %v885_v47 = vadd.f32 %v5014_v44, %v884_v46  ;;  %4310 = vmatprep.mubr.msk.f32.mxu1 %vm1212_vm2, %v1145_v42  ;;  %v526_v42 = vld [vmem:[%s4971_s23 + $0x180] sm:$0xff] }
 0x108   : > { %v1148_v49 = vmax.f32 %v890_v45, 0.0  ;;  %4311 = vmatmul.mubr.msk.f32.gmra.mrb[76].mxu1 %vm1212_vm2, %v1146_v40  ;;  %v525_v40 = vld [vmem:[%s4971_s23 + $0x178] sm:$0xff] }
 0x109   : > { %v1147_v51 = vmax.f32 %v885_v47, 0.0  ;;  %v4206_v52 = vpop.f32.mrb[16].mxu1  ;;  %4462 = vmatmul.mubr.msk.f32.gmra.mrb[46].mxu0 %vm1860_vm1, %v525_v40 }
 0x10a   : > { %v900_v53 = vadd.f32 %v4206_v52, %v5014_v44  ;;  %v894_v54 = vpop.f32.mrb[17].mxu1  ;;  %4464 = vmatprep.mubr.msk.f32.mxu0 %vm1860_vm1, %v526_v42 }
 0x10b   : > { %v895_v55 = vadd.f32 %v5014_v44, %v894_v54  ;;  %4313 = vmatprep.mubr.msk.f32.mxu1 %vm1212_vm2, %v1147_v51  ;;  %v528_v51 = vld [vmem:[%s4971_s23 + $0x190] sm:$0xff] }
 0x10c   : > { %v1150_v57 = vmax.f32 %v900_v53, 0.0  ;;  %4314 = vmatmul.mubr.msk.f32.gmra.mrb[78].mxu1 %vm1212_vm2, %v1148_v49  ;;  %v527_v49 = vld [vmem:[%s4971_s23 + $0x188] sm:$0xff] }
 0x10d   : > { %v1149_v59 = vmax.f32 %v895_v55, 0.0  ;;  %v4209_v60 = vpop.f32.mrb[18].mxu1  ;;  %4465 = vmatmul.mubr.msk.f32.gmra.mrb[48].mxu0 %vm1860_vm1, %v527_v49 }
 0x10e   : > { %v910_v61 = vadd.f32 %v4209_v60, %v5014_v44  ;;  %v904_v62 = vpop.f32.mrb[19].mxu1  ;;  %4467 = vmatprep.mubr.msk.f32.mxu0 %vm1860_vm1, %v528_v51 }
 0x10f   : > { %v905_v63 = vadd.f32 %v5014_v44, %v904_v62  ;;  %4316 = vmatprep.mubr.msk.f32.mxu1 %vm1212_vm2, %v1149_v59  ;;  %v530_v59 = vld [vmem:[%s4971_s23 + $0x1a0] sm:$0xff] }
 0x110   : > { %v1152_v1 = vmax.f32 %v910_v61, 0.0  ;;  %4317 = vmatmul.mubr.msk.f32.gmra.mrb[80].mxu1 %vm1212_vm2, %v1150_v57  ;;  %v529_v57 = vld [vmem:[%s4971_s23 + $0x198] sm:$0xff] }
 0x111   : > { %v1151_v3 = vmax.f32 %v905_v63, 0.0  ;;  %v4212_v4 = vpop.f32.mrb[20].mxu1  ;;  %4468 = vmatmul.mubr.msk.f32.gmra.mrb[50].mxu0 %vm1860_vm1, %v529_v57 }
 0x112   : > { %v920_v5 = vadd.f32 %v4212_v4, %v5014_v44  ;;  %v914_v6 = vpop.f32.mrb[21].mxu1  ;;  %4470 = vmatprep.mubr.msk.f32.mxu0 %vm1860_vm1, %v530_v59 }
 0x113   : > { %v915_v7 = vadd.f32 %v5014_v44, %v914_v6  ;;  %4319 = vmatprep.mubr.msk.f32.mxu1 %vm1212_vm2, %v1151_v3  ;;  %v532_v3 = vld [vmem:[%s4971_s23 + $0x1b0] sm:$0xff] }
 0x114   : > { %v1154_v9 = vmax.f32 %v920_v5, 0.0  ;;  %4320 = vmatmul.mubr.msk.f32.gmra.mrb[82].mxu1 %vm1212_vm2, %v1152_v1  ;;  %v531_v1 = vld [vmem:[%s4971_s23 + $0x1a8] sm:$0xff] }
 0x115   : > { %v1153_v11 = vmax.f32 %v915_v7, 0.0  ;;  %v4215_v12 = vpop.f32.mrb[22].mxu1  ;;  %4471 = vmatmul.mubr.msk.f32.gmra.mrb[52].mxu0 %vm1860_vm1, %v531_v1 }
 0x116   : > { %v930_v13 = vadd.f32 %v4215_v12, %v5014_v44  ;;  %v924_v14 = vpop.f32.mrb[23].mxu1  ;;  %4473 = vmatprep.mubr.msk.f32.mxu0 %vm1860_vm1, %v532_v3 }
 0x117   : > { %v925_v15 = vadd.f32 %v5014_v44, %v924_v14  ;;  %4322 = vmatprep.mubr.msk.f32.mxu1 %vm1212_vm2, %v1153_v11  ;;  %v534_v11 = vld [vmem:[%s4971_s23 + $0x1c0] sm:$0xff] }
 0x118   : > { %v1156_v17 = vmax.f32 %v930_v13, 0.0  ;;  %4323 = vmatmul.mubr.msk.f32.gmra.mrb[84].mxu1 %vm1212_vm2, %v1154_v9  ;;  %v533_v9 = vld [vmem:[%s4971_s23 + $0x1b8] sm:$0xff] }
 0x119   : > { %v1155_v19 = vmax.f32 %v925_v15, 0.0  ;;  %v4218_v20 = vpop.f32.mrb[24].mxu1  ;;  %4474 = vmatmul.mubr.msk.f32.gmra.mrb[54].mxu0 %vm1860_vm1, %v533_v9 }
 0x11a   : > { %v940_v21 = vadd.f32 %v4218_v20, %v5014_v44  ;;  %v934_v22 = vpop.f32.mrb[25].mxu1  ;;  %4476 = vmatprep.mubr.msk.f32.mxu0 %vm1860_vm1, %v534_v11 }
 0x11b   : > { %v935_v23 = vadd.f32 %v5014_v44, %v934_v22  ;;  %4325 = vmatprep.mubr.msk.f32.mxu1 %vm1212_vm2, %v1155_v19  ;;  %v536_v19 = vld [vmem:[%s4971_s23 + $0x1d0] sm:$0xff] }
 0x11c   : > { %v1158_v25 = vmax.f32 %v940_v21, 0.0  ;;  %4326 = vmatmul.mubr.msk.f32.gmra.mrb[86].mxu1 %vm1212_vm2, %v1156_v17  ;;  %v535_v17 = vld [vmem:[%s4971_s23 + $0x1c8] sm:$0xff] }
 0x11d   : > { %v1157_v27 = vmax.f32 %v935_v23, 0.0  ;;  %v4221_v28 = vpop.f32.mrb[26].mxu1  ;;  %4477 = vmatmul.mubr.msk.f32.gmra.mrb[56].mxu0 %vm1860_vm1, %v535_v17 }
 0x11e   : > { %v950_v29 = vadd.f32 %v4221_v28, %v5014_v44  ;;  %v944_v30 = vpop.f32.mrb[27].mxu1  ;;  %4479 = vmatprep.mubr.msk.f32.mxu0 %vm1860_vm1, %v536_v19 }
 0x11f   : > { %v945_v31 = vadd.f32 %v5014_v44, %v944_v30  ;;  %4328 = vmatprep.mubr.msk.f32.mxu1 %vm1212_vm2, %v1157_v27  ;;  %v538_v27 = vld [vmem:[%s4971_s23 + $0x1e0] sm:$0xff] }
 0x120   : > { %v1160_v33 = vmax.f32 %v950_v29, 0.0  ;;  %4329 = vmatmul.mubr.msk.f32.gmra.mrb[88].mxu1 %vm1212_vm2, %v1158_v25  ;;  %v537_v25 = vld [vmem:[%s4971_s23 + $0x1d8] sm:$0xff] }
 0x121   : > { %v1159_v35 = vmax.f32 %v945_v31, 0.0  ;;  %v4224_v36 = vpop.f32.mrb[28].mxu1  ;;  %4480 = vmatmul.mubr.msk.f32.gmra.mrb[58].mxu0 %vm1860_vm1, %v537_v25 }
 0x122   : > { %v960_v37 = vadd.f32 %v4224_v36, %v5014_v44  ;;  %v954_v38 = vpop.f32.mrb[29].mxu1  ;;  %4482 = vmatprep.mubr.msk.f32.mxu0 %vm1860_vm1, %v538_v27 }
 0x123   : > { %v955_v39 = vadd.f32 %v5014_v44, %v954_v38  ;;  %4331 = vmatprep.mubr.msk.f32.mxu1 %vm1212_vm2, %v1159_v35 }
 0x124   : > { %v1162_v41 = vmax.f32 %v960_v37, 0.0  ;;  %4332 = vmatmul.mubr.msk.f32.gmra.mrb[90].mxu1 %vm1212_vm2, %v1160_v33  ;;  %v539_v33 = vld [vmem:[%s4971_s23 + $0x1e8] sm:$0xff] }
 0x125   : > { %v1161_v43 = vmax.f32 %v955_v39, 0.0  ;;  %v4227_v45 = vpop.f32.mrb[30].mxu1  ;;  %4483 = vmatmul.mubr.msk.f32.gmra.mrb[60].mxu0 %vm1860_vm1, %v539_v33 }
 0x126   : > { %v970_v46 = vadd.f32 %v4227_v45, %v5014_v44  ;;  %v964_v47 = vpop.f32.mrb[31].mxu1  ;;  %v541_v45 = vld [vmem:[%s4971_s23 + $0x1f8] sm:$0xff] }
 0x127   : > { %v965_v48 = vadd.f32 %v5014_v44, %v964_v47  ;;  %4334 = vmatprep.mubr.msk.f32.mxu1 %vm1212_vm2, %v1161_v43 }
 0x128   : > { %v1164_v50 = vmax.f32 %v970_v46, 0.0  ;;  %4335 = vmatmul.mubr.msk.f32.gmra.mrb[92].mxu1 %vm1212_vm2, %v1162_v41  ;;  %v540_v41 = vld [vmem:[%s4971_s23 + $0x1f0] sm:$0xff] }
 0x129   : > { %v1163_v52 = vmax.f32 %v965_v48, 0.0  ;;  %v4230_v53 = vpop.f32.mrb[32].mxu1  ;;  %4485 = vmatprep.mubr.msk.f32.mxu0 %vm1860_vm1, %v540_v41 }
 0x12a   : > { %v980_v54 = vadd.f32 %v4230_v53, %v5014_v44  ;;  %v974_v55 = vpop.f32.mrb[33].mxu1  ;;  %4486 = vmatmul.mubr.msk.f32.gmra.mrb[62].mxu0 %vm1860_vm1, %v541_v45 }
 0x12b   : > { %v975_v56 = vadd.f32 %v5014_v44, %v974_v55  ;;  %4337 = vmatprep.mubr.msk.f32.mxu1 %vm1212_vm2, %v1163_v52 }
 0x12c   : > { %v1166_v58 = vmax.f32 %v980_v54, 0.0  ;;  %4338 = vmatmul.mubr.msk.f32.gmra.mrb[94].mxu1 %vm1212_vm2, %v1164_v50 }
 0x12d   : > { %v1165_v60 = vmax.f32 %v975_v56, 0.0  ;;  %v4233_v61 = vpop.f32.mrb[34].mxu1 }
 0x12e   : > { %v990_v62 = vadd.f32 %v4233_v61, %v5014_v44  ;;  %v984_v63 = vpop.f32.mrb[35].mxu1 }
 0x12f   : > { %v985_v0 = vadd.f32 %v5014_v44, %v984_v63  ;;  %4340 = vmatprep.mubr.msk.f32.mxu1 %vm1212_vm2, %v1165_v60 }
 0x130   : > { %v1168_v2 = vmax.f32 %v990_v62, 0.0  ;;  %4341 = vmatmul.mubr.msk.f32.gmra.mrb[96].mxu1 %vm1212_vm2, %v1166_v58 }
 0x131   : > { %v1167_v4 = vmax.f32 %v985_v0, 0.0  ;;  %v4236_v5 = vpop.f32.mrb[36].mxu1 }
 0x132   : > { %v1000_v6 = vadd.f32 %v4236_v5, %v5014_v44  ;;  %v994_v7 = vpop.f32.mrb[37].mxu1 }
 0x133   : > { %v995_v8 = vadd.f32 %v5014_v44, %v994_v7  ;;  %4343 = vmatprep.mubr.msk.f32.mxu1 %vm1212_vm2, %v1167_v4 }
 0x134   : > { %v1170_v10 = vmax.f32 %v1000_v6, 0.0  ;;  %4344 = vmatmul.mubr.msk.f32.gmra.mrb[98].mxu1 %vm1212_vm2, %v1168_v2 }
 0x135   : > { %v1169_v12 = vmax.f32 %v995_v8, 0.0  ;;  %v4239_v13 = vpop.f32.mrb[38].mxu1 }
 0x136   : > { %v1010_v14 = vadd.f32 %v4239_v13, %v5014_v44  ;;  %v1004_v15 = vpop.f32.mrb[39].mxu1 }
 0x137   : > { %v1005_v16 = vadd.f32 %v5014_v44, %v1004_v15  ;;  %4346 = vmatprep.mubr.msk.f32.mxu1 %vm1212_vm2, %v1169_v12 }
 0x138   : > { %v1172_v18 = vmax.f32 %v1010_v14, 0.0  ;;  %4347 = vmatmul.mubr.msk.f32.gmra.mrb[100].mxu1 %vm1212_vm2, %v1170_v10 }
 0x139   : > { %v1171_v20 = vmax.f32 %v1005_v16, 0.0  ;;  %v4242_v21 = vpop.f32.mrb[40].mxu1 }
 0x13a   : > { %v1020_v22 = vadd.f32 %v4242_v21, %v5014_v44  ;;  %v1014_v23 = vpop.f32.mrb[41].mxu1 }
 0x13b   : > { %v1015_v24 = vadd.f32 %v5014_v44, %v1014_v23  ;;  %4349 = vmatprep.mubr.msk.f32.mxu1 %vm1212_vm2, %v1171_v20 }
 0x13c   : > { %v1174_v26 = vmax.f32 %v1020_v22, 0.0  ;;  %4350 = vmatmul.mubr.msk.f32.gmra.mrb[102].mxu1 %vm1212_vm2, %v1172_v18 }
 0x13d   : > { %v1173_v28 = vmax.f32 %v1015_v24, 0.0  ;;  %v4245_v29 = vpop.f32.mrb[42].mxu1 }
 0x13e   : > { %v1030_v30 = vadd.f32 %v4245_v29, %v5014_v44  ;;  %v1024_v31 = vpop.f32.mrb[43].mxu1 }
 0x13f   : > { %v1025_v32 = vadd.f32 %v5014_v44, %v1024_v31  ;;  %4352 = vmatprep.mubr.msk.f32.mxu1 %vm1212_vm2, %v1173_v28 }
 0x140   : > { %v1176_v34 = vmax.f32 %v1030_v30, 0.0  ;;  %4353 = vmatmul.mubr.msk.f32.gmra.mrb[104].mxu1 %vm1212_vm2, %v1174_v26 }
 0x141   : > { %v1175_v35 = vmax.f32 %v1025_v32, 0.0  ;;  %v4248_v36 = vpop.f32.mrb[44].mxu1 }
 0x142   : > { %v1040_v37 = vadd.f32 %v4248_v36, %v5014_v44  ;;  %v1034_v38 = vpop.f32.mrb[45].mxu1 }
 0x143   : > { %v1035_v39 = vadd.f32 %v5014_v44, %v1034_v38  ;;  %4355 = vmatprep.mubr.msk.f32.mxu1 %vm1212_vm2, %v1175_v35  ;;  %v5249_v35 = vld [vmem:[%s5789_s5] ss:$0 sm:$0xff] }
 0x144   : > { %v1178_v40 = vmax.f32 %v1040_v37, 0.0  ;;  %4356 = vmatmul.mubr.msk.f32.gmra.mrb[106].mxu1 %vm1212_vm2, %v1176_v34 }
 0x145   : > { %v1177_v42 = vmax.f32 %v1035_v39, 0.0  ;;  %v4251_v43 = vpop.f32.mrb[46].mxu1 }
 0x146   : > { %v1050_v46 = vadd.f32 %v4251_v43, %v5014_v44  ;;  %v1044_v47 = vpop.f32.mrb[47].mxu1 }
 0x147   : > { %v1045_v48 = vadd.f32 %v5014_v44, %v1044_v47  ;;  %4358 = vmatprep.mubr.msk.f32.mxu1 %vm1212_vm2, %v1177_v42 }
 0x148   : > { %v1180_v49 = vmax.f32 %v1050_v46, 0.0  ;;  %4359 = vmatmul.mubr.msk.f32.gmra.mrb[108].mxu1 %vm1212_vm2, %v1178_v40 }
 0x149   : > { %v1179_v50 = vmax.f32 %v1045_v48, 0.0  ;;  %v4254_v51 = vpop.f32.mrb[48].mxu1 }
 0x14a   : > { %v1060_v52 = vadd.f32 %v4254_v51, %v5014_v44  ;;  %v1054_v53 = vpop.f32.mrb[49].mxu1 }
 0x14b   : > { %v1055_v54 = vadd.f32 %v5014_v44, %v1054_v53  ;;  %4361 = vmatprep.mubr.msk.f32.mxu1 %vm1212_vm2, %v1179_v50 }
 0x14c   : > { %v1182_v55 = vmax.f32 %v1060_v52, 0.0  ;;  %4362 = vmatmul.mubr.msk.f32.gmra.mrb[110].mxu1 %vm1212_vm2, %v1180_v49 }
 0x14d   : > { %v1181_v56 = vmax.f32 %v1055_v54, 0.0  ;;  %v4257_v57 = vpop.f32.mrb[50].mxu1 }
 0x14e   : > { %v1070_v58 = vadd.f32 %v4257_v57, %v5014_v44  ;;  %v1064_v59 = vpop.f32.mrb[51].mxu1 }
 0x14f   : > { %v1065_v60 = vadd.f32 %v5014_v44, %v1064_v59  ;;  %4364 = vmatprep.mubr.msk.f32.mxu1 %vm1212_vm2, %v1181_v56 }
 0x150   : > { %v1184_v61 = vmax.f32 %v1070_v58, 0.0  ;;  %4365 = vmatmul.mubr.msk.f32.gmra.mrb[112].mxu1 %vm1212_vm2, %v1182_v55 }
 0x151   : > { %v1183_v62 = vmax.f32 %v1065_v60, 0.0  ;;  %v4260_v63 = vpop.f32.mrb[52].mxu1 }
 0x152   : > { %v1080_v0 = vadd.f32 %v4260_v63, %v5014_v44  ;;  %v1074_v1 = vpop.f32.mrb[53].mxu1 }
 0x153   : > { %v1075_v2 = vadd.f32 %v5014_v44, %v1074_v1  ;;  %4367 = vmatprep.mubr.msk.f32.mxu1 %vm1212_vm2, %v1183_v62 }
 0x154   : > { %v1186_v3 = vmax.f32 %v1080_v0, 0.0  ;;  %4368 = vmatmul.mubr.msk.f32.gmra.mrb[114].mxu1 %vm1212_vm2, %v1184_v61 }
 0x155   : > { %v1185_v4 = vmax.f32 %v1075_v2, 0.0  ;;  %v4263_v5 = vpop.f32.mrb[54].mxu1 }
 0x156   : > { %v1090_v6 = vadd.f32 %v4263_v5, %v5014_v44  ;;  %v1084_v7 = vpop.f32.mrb[55].mxu1 }
 0x157   : > { %v1085_v8 = vadd.f32 %v5014_v44, %v1084_v7  ;;  %4370 = vmatprep.mubr.msk.f32.mxu1 %vm1212_vm2, %v1185_v4 }
 0x158   : > { %v1188_v9 = vmax.f32 %v1090_v6, 0.0  ;;  %4371 = vmatmul.mubr.msk.f32.gmra.mrb[116].mxu1 %vm1212_vm2, %v1186_v3 }
 0x159   : > { %v1187_v10 = vmax.f32 %v1085_v8, 0.0  ;;  %v4266_v11 = vpop.f32.mrb[56].mxu1 }
 0x15a   : > { %v1100_v12 = vadd.f32 %v4266_v11, %v5014_v44  ;;  %v1094_v13 = vpop.f32.mrb[57].mxu1 }
 0x15b   : > { %v1095_v14 = vadd.f32 %v5014_v44, %v1094_v13  ;;  %4373 = vmatprep.mubr.msk.f32.mxu1 %vm1212_vm2, %v1187_v10 }
 0x15c   : > { %v1190_v15 = vmax.f32 %v1100_v12, 0.0  ;;  %4374 = vmatmul.mubr.msk.f32.gmra.mrb[118].mxu1 %vm1212_vm2, %v1188_v9 }
 0x15d   : > { %v1189_v16 = vmax.f32 %v1095_v14, 0.0  ;;  %v4269_v17 = vpop.f32.mrb[58].mxu1 }
 0x15e   : > { %v1110_v18 = vadd.f32 %v4269_v17, %v5014_v44  ;;  %v1104_v19 = vpop.f32.mrb[59].mxu1 }
 0x15f   : > { %v1105_v20 = vadd.f32 %v5014_v44, %v1104_v19  ;;  %4376 = vmatprep.mubr.msk.f32.mxu1 %vm1212_vm2, %v1189_v16 }
 0x160   : > { %v1192_v21 = vmax.f32 %v1110_v18, 0.0  ;;  %4377 = vmatmul.mubr.msk.f32.gmra.mrb[120].mxu1 %vm1212_vm2, %v1190_v15 }
 0x161   : > { %v1191_v22 = vmax.f32 %v1105_v20, 0.0  ;;  %v4272_v23 = vpop.f32.mrb[60].mxu1 }
 0x162   : > { %v1120_v24 = vadd.f32 %v4272_v23, %v5014_v44  ;;  %v1114_v25 = vpop.f32.mrb[61].mxu1 }
 0x163   : > { %v1115_v26 = vadd.f32 %v5014_v44, %v1114_v25  ;;  %4379 = vmatprep.mubr.msk.f32.mxu1 %vm1212_vm2, %v1191_v22 }
 0x164   : > { %v1194_v27 = vmax.f32 %v1120_v24, 0.0  ;;  %4380 = vmatmul.mubr.msk.f32.gmra.mrb[122].mxu1 %vm1212_vm2, %v1192_v21 }
 0x165   : > { %v1193_v28 = vmax.f32 %v1115_v26, 0.0  ;;  %v4275_v29 = vpop.f32.mrb[62].mxu1 }
 0x166   : > { %v1130_v30 = vadd.f32 %v4275_v29, %v5014_v44  ;;  %v1124_v31 = vpop.f32.mrb[63].mxu1 }
 0x167   : > { %v1125_v32 = vadd.f32 %v5014_v44, %v1124_v31  ;;  %4382 = vmatprep.mubr.msk.f32.mxu1 %vm1212_vm2, %v1193_v28 }
 0x168   : > { %v1196_v33 = vmax.f32 %v1130_v30, 0.0  ;;  %4383 = vmatmul.mubr.msk.f32.gmra.mrb[124].mxu1 %vm1212_vm2, %v1194_v27 }
 0x169   : > { %v1195_v34 = vmax.f32 %v1125_v32, 0.0 }
 0x16b   : > { %4385 = vmatprep.mubr.msk.f32.mxu1 %vm1212_vm2, %v1195_v34 }
 0x16c   : > { %4386 = vmatmul.mubr.msk.f32.gmra.mrb[126].mxu1 %vm1212_vm2, %v1196_v33 }
 0x1c3   : > { %v4294_v36 = vpop.f32.mrb[64].mxu1 }
 0x1c4   : > { %v1477_v37 = vadd.f32 %v4294_v36, %v5249_v35  ;;  %v1471_v38 = vpop.f32.mrb[65].mxu1 }
 0x1c5   : > { %v1472_v44 = vadd.f32 %v5249_v35, %v1471_v38 }
 0x1c6   : > { %v1791_v41 = vmax.f32 %v1477_v37, 0.0 }
 0x1c7   : > { %v1790_v39 = vmax.f32 %v1472_v44, 0.0  ;;  %v4297_v40 = vpop.f32.mrb[66].mxu1 }
 0x1c8   : > { %v1487_v42 = vadd.f32 %v4297_v40, %v5249_v35  ;;  %v1481_v43 = vpop.f32.mrb[67].mxu1 }
 0x1c9   : > { %v1482_v45 = vadd.f32 %v5249_v35, %v1481_v43  ;;  %4496 = vmatprep.mubr.msk.f32.mxu0 %vm2438_vm3, %v1790_v39 }
 0x1ca   : > { %4497 = vmatmul.mubr.msk.f32.vlgmr.msra.gmra.mrb[0].mxu0 %vm2438_vm3, %v1791_v41  ;;  %v1793_v48 = vmax.f32 %v1487_v42, 0.0 }
 0x1cb   : > { %v1792_v46 = vmax.f32 %v1482_v45, 0.0  ;;  %v4300_v47 = vpop.f32.mrb[68].mxu1 }
 0x1cc   : > { %v1497_v49 = vadd.f32 %v4300_v47, %v5249_v35  ;;  %v1491_v50 = vpop.f32.mrb[69].mxu1 }
 0x1cd   : > { %v1492_v51 = vadd.f32 %v5249_v35, %v1491_v50  ;;  %4499 = vmatprep.mubr.msk.f32.mxu0 %vm2438_vm3, %v1792_v46 }
 0x1ce   : > { %v1795_v52 = vmax.f32 %v1497_v49, 0.0  ;;  %4500 = vmatmul.mubr.msk.f32.gmra.mrb[2].mxu0 %vm2438_vm3, %v1793_v48 }
 0x1cf   : > { %v1794_v53 = vmax.f32 %v1492_v51, 0.0  ;;  %v4303_v54 = vpop.f32.mrb[70].mxu1 }
 0x1d0   : > { %v1507_v55 = vadd.f32 %v4303_v54, %v5249_v35  ;;  %v1501_v56 = vpop.f32.mrb[71].mxu1 }
 0x1d1   : > { %v1502_v57 = vadd.f32 %v5249_v35, %v1501_v56  ;;  %4502 = vmatprep.mubr.msk.f32.mxu0 %vm2438_vm3, %v1794_v53 }
 0x1d2   : > { %v1797_v58 = vmax.f32 %v1507_v55, 0.0  ;;  %4503 = vmatmul.mubr.msk.f32.gmra.mrb[4].mxu0 %vm2438_vm3, %v1795_v52 }
 0x1d3   : > { %v1796_v59 = vmax.f32 %v1502_v57, 0.0  ;;  %v4306_v60 = vpop.f32.mrb[72].mxu1 }
 0x1d4   : > { %v1517_v61 = vadd.f32 %v4306_v60, %v5249_v35  ;;  %v1511_v62 = vpop.f32.mrb[73].mxu1 }
 0x1d5   : > { %v1512_v63 = vadd.f32 %v5249_v35, %v1511_v62  ;;  %4505 = vmatprep.mubr.msk.f32.mxu0 %vm2438_vm3, %v1796_v59 }
 0x1d6   : > { %v1799_v0 = vmax.f32 %v1517_v61, 0.0  ;;  %4506 = vmatmul.mubr.msk.f32.gmra.mrb[6].mxu0 %vm2438_vm3, %v1797_v58 }
 0x1d7   : > { %v1798_v1 = vmax.f32 %v1512_v63, 0.0  ;;  %v4309_v2 = vpop.f32.mrb[74].mxu1 }
 0x1d8   : > { %v1527_v3 = vadd.f32 %v4309_v2, %v5249_v35  ;;  %v1521_v4 = vpop.f32.mrb[75].mxu1 }
 0x1d9   : > { %v1522_v5 = vadd.f32 %v5249_v35, %v1521_v4  ;;  %4508 = vmatprep.mubr.msk.f32.mxu0 %vm2438_vm3, %v1798_v1 }
 0x1da   : > { %v1801_v6 = vmax.f32 %v1527_v3, 0.0  ;;  %4509 = vmatmul.mubr.msk.f32.gmra.mrb[8].mxu0 %vm2438_vm3, %v1799_v0 }
 0x1db   : > { %v1800_v7 = vmax.f32 %v1522_v5, 0.0  ;;  %v4312_v8 = vpop.f32.mrb[76].mxu1 }
 0x1dc   : > { %v1537_v9 = vadd.f32 %v4312_v8, %v5249_v35  ;;  %v1531_v10 = vpop.f32.mrb[77].mxu1 }
 0x1dd   : > { %v1532_v11 = vadd.f32 %v5249_v35, %v1531_v10  ;;  %4511 = vmatprep.mubr.msk.f32.mxu0 %vm2438_vm3, %v1800_v7 }
 0x1de   : > { %v1803_v12 = vmax.f32 %v1537_v9, 0.0  ;;  %4512 = vmatmul.mubr.msk.f32.gmra.mrb[10].mxu0 %vm2438_vm3, %v1801_v6 }
 0x1df   : > { %v1802_v13 = vmax.f32 %v1532_v11, 0.0  ;;  %v4315_v14 = vpop.f32.mrb[78].mxu1 }
 0x1e0   : > { %v1547_v15 = vadd.f32 %v4315_v14, %v5249_v35  ;;  %v1541_v16 = vpop.f32.mrb[79].mxu1 }
 0x1e1   : > { %v1542_v17 = vadd.f32 %v5249_v35, %v1541_v16  ;;  %4514 = vmatprep.mubr.msk.f32.mxu0 %vm2438_vm3, %v1802_v13 }
 0x1e2   : > { %v1805_v18 = vmax.f32 %v1547_v15, 0.0  ;;  %4515 = vmatmul.mubr.msk.f32.gmra.mrb[12].mxu0 %vm2438_vm3, %v1803_v12 }
 0x1e3   : > { %v1804_v19 = vmax.f32 %v1542_v17, 0.0  ;;  %v4318_v20 = vpop.f32.mrb[80].mxu1 }
 0x1e4   : > { %v1557_v21 = vadd.f32 %v4318_v20, %v5249_v35  ;;  %v1551_v22 = vpop.f32.mrb[81].mxu1 }
 0x1e5   : > { %v1552_v23 = vadd.f32 %v5249_v35, %v1551_v22  ;;  %4517 = vmatprep.mubr.msk.f32.mxu0 %vm2438_vm3, %v1804_v19 }
 0x1e6   : > { %v1807_v24 = vmax.f32 %v1557_v21, 0.0  ;;  %4518 = vmatmul.mubr.msk.f32.gmra.mrb[14].mxu0 %vm2438_vm3, %v1805_v18 }
 0x1e7   : > { %v1806_v25 = vmax.f32 %v1552_v23, 0.0  ;;  %v4321_v26 = vpop.f32.mrb[82].mxu1 }
 0x1e8   : > { %v1567_v27 = vadd.f32 %v4321_v26, %v5249_v35  ;;  %v1561_v28 = vpop.f32.mrb[83].mxu1 }
 0x1e9   : > { %v1562_v29 = vadd.f32 %v5249_v35, %v1561_v28  ;;  %4520 = vmatprep.mubr.msk.f32.mxu0 %vm2438_vm3, %v1806_v25 }
 0x1ea   : > { %v1809_v30 = vmax.f32 %v1567_v27, 0.0  ;;  %4521 = vmatmul.mubr.msk.f32.gmra.mrb[16].mxu0 %vm2438_vm3, %v1807_v24 }
 0x1eb   : > { %v1808_v31 = vmax.f32 %v1562_v29, 0.0  ;;  %v4324_v32 = vpop.f32.mrb[84].mxu1 }
 0x1ec   : > { %v1577_v33 = vadd.f32 %v4324_v32, %v5249_v35  ;;  %v1571_v34 = vpop.f32.mrb[85].mxu1 }
 0x1ed   : > { %v1572_v36 = vadd.f32 %v5249_v35, %v1571_v34  ;;  %4523 = vmatprep.mubr.msk.f32.mxu0 %vm2438_vm3, %v1808_v31 }
 0x1ee   : > { %v1811_v37 = vmax.f32 %v1577_v33, 0.0  ;;  %4524 = vmatmul.mubr.msk.f32.gmra.mrb[18].mxu0 %vm2438_vm3, %v1809_v30 }
 0x1ef   : > { %v1810_v38 = vmax.f32 %v1572_v36, 0.0  ;;  %v4327_v44 = vpop.f32.mrb[86].mxu1 }
 0x1f0   : > { %v1587_v39 = vadd.f32 %v4327_v44, %v5249_v35  ;;  %v1581_v40 = vpop.f32.mrb[87].mxu1 }
 0x1f1   : > { %v1582_v41 = vadd.f32 %v5249_v35, %v1581_v40  ;;  %4526 = vmatprep.mubr.msk.f32.mxu0 %vm2438_vm3, %v1810_v38 }
 0x1f2   : > { %v1813_v42 = vmax.f32 %v1587_v39, 0.0  ;;  %4527 = vmatmul.mubr.msk.f32.gmra.mrb[20].mxu0 %vm2438_vm3, %v1811_v37 }
 0x1f3   : > { %v1812_v43 = vmax.f32 %v1582_v41, 0.0  ;;  %v4330_v45 = vpop.f32.mrb[88].mxu1 }
 0x1f4   : > { %v1597_v46 = vadd.f32 %v4330_v45, %v5249_v35  ;;  %v1591_v47 = vpop.f32.mrb[89].mxu1 }
 0x1f5   : > { %v1592_v48 = vadd.f32 %v5249_v35, %v1591_v47  ;;  %4529 = vmatprep.mubr.msk.f32.mxu0 %vm2438_vm3, %v1812_v43 }
 0x1f6   : > { %v1815_v49 = vmax.f32 %v1597_v46, 0.0  ;;  %4530 = vmatmul.mubr.msk.f32.gmra.mrb[22].mxu0 %vm2438_vm3, %v1813_v42 }
 0x1f7   : > { %v1814_v50 = vmax.f32 %v1592_v48, 0.0  ;;  %v4333_v51 = vpop.f32.mrb[90].mxu1 }
 0x1f8   : > { %v1607_v52 = vadd.f32 %v4333_v51, %v5249_v35  ;;  %v1601_v53 = vpop.f32.mrb[91].mxu1 }
 0x1f9   : > { %v1602_v54 = vadd.f32 %v5249_v35, %v1601_v53  ;;  %4532 = vmatprep.mubr.msk.f32.mxu0 %vm2438_vm3, %v1814_v50 }
 0x1fa   : > { %v1817_v55 = vmax.f32 %v1607_v52, 0.0  ;;  %4533 = vmatmul.mubr.msk.f32.gmra.mrb[24].mxu0 %vm2438_vm3, %v1815_v49 }
 0x1fb   : > { %v1816_v56 = vmax.f32 %v1602_v54, 0.0  ;;  %v4336_v57 = vpop.f32.mrb[92].mxu1 }
 0x1fc   : > { %v1617_v58 = vadd.f32 %v4336_v57, %v5249_v35  ;;  %v1611_v59 = vpop.f32.mrb[93].mxu1 }
 0x1fd   : > { %v1612_v60 = vadd.f32 %v5249_v35, %v1611_v59  ;;  %4535 = vmatprep.mubr.msk.f32.mxu0 %vm2438_vm3, %v1816_v56 }
 0x1fe   : > { %v1819_v61 = vmax.f32 %v1617_v58, 0.0  ;;  %4536 = vmatmul.mubr.msk.f32.gmra.mrb[26].mxu0 %vm2438_vm3, %v1817_v55 }
 0x1ff   : > { %v1818_v62 = vmax.f32 %v1612_v60, 0.0  ;;  %v4339_v63 = vpop.f32.mrb[94].mxu1 }
 0x200   : > { %v1627_v0 = vadd.f32 %v4339_v63, %v5249_v35  ;;  %v1621_v1 = vpop.f32.mrb[95].mxu1 }
 0x201   : > { %v1622_v2 = vadd.f32 %v5249_v35, %v1621_v1  ;;  %4538 = vmatprep.mubr.msk.f32.mxu0 %vm2438_vm3, %v1818_v62 }
 0x202   : > { %v1821_v3 = vmax.f32 %v1627_v0, 0.0  ;;  %4539 = vmatmul.mubr.msk.f32.gmra.mrb[28].mxu0 %vm2438_vm3, %v1819_v61 }
 0x203   : > { %v1820_v4 = vmax.f32 %v1622_v2, 0.0  ;;  %v4342_v5 = vpop.f32.mrb[96].mxu1 }
 0x204   : > { %v1637_v6 = vadd.f32 %v4342_v5, %v5249_v35  ;;  %v1631_v7 = vpop.f32.mrb[97].mxu1 }
 0x205   : > { %v1632_v8 = vadd.f32 %v5249_v35, %v1631_v7  ;;  %4541 = vmatprep.mubr.msk.f32.mxu0 %vm2438_vm3, %v1820_v4 }
 0x206   : > { %v1823_v9 = vmax.f32 %v1637_v6, 0.0  ;;  %4542 = vmatmul.mubr.msk.f32.gmra.mrb[30].mxu0 %vm2438_vm3, %v1821_v3 }
 0x207   : > { %v1822_v10 = vmax.f32 %v1632_v8, 0.0  ;;  %v4345_v11 = vpop.f32.mrb[98].mxu1 }
 0x208   : > { %v1647_v12 = vadd.f32 %v4345_v11, %v5249_v35  ;;  %v1641_v13 = vpop.f32.mrb[99].mxu1 }
 0x209   : > { %v1642_v14 = vadd.f32 %v5249_v35, %v1641_v13  ;;  %4544 = vmatprep.mubr.msk.f32.mxu0 %vm2438_vm3, %v1822_v10 }
 0x20a   : > { %v1825_v15 = vmax.f32 %v1647_v12, 0.0  ;;  %4545 = vmatmul.mubr.msk.f32.gmra.mrb[32].mxu0 %vm2438_vm3, %v1823_v9 }
 0x20b   : > { %v1824_v16 = vmax.f32 %v1642_v14, 0.0  ;;  %v4348_v17 = vpop.f32.mrb[100].mxu1 }
 0x20c   : > { %v1657_v18 = vadd.f32 %v4348_v17, %v5249_v35  ;;  %v1651_v19 = vpop.f32.mrb[101].mxu1 }
 0x20d   : > { %v1652_v20 = vadd.f32 %v5249_v35, %v1651_v19  ;;  %4547 = vmatprep.mubr.msk.f32.mxu0 %vm2438_vm3, %v1824_v16 }
 0x20e   : > { %v1827_v21 = vmax.f32 %v1657_v18, 0.0  ;;  %4548 = vmatmul.mubr.msk.f32.gmra.mrb[34].mxu0 %vm2438_vm3, %v1825_v15 }
 0x20f   : > { %v1826_v22 = vmax.f32 %v1652_v20, 0.0  ;;  %v4351_v23 = vpop.f32.mrb[102].mxu1 }
 0x210   : > { %v1667_v24 = vadd.f32 %v4351_v23, %v5249_v35  ;;  %v1661_v25 = vpop.f32.mrb[103].mxu1 }
 0x211   : > { %v1662_v26 = vadd.f32 %v5249_v35, %v1661_v25  ;;  %4550 = vmatprep.mubr.msk.f32.mxu0 %vm2438_vm3, %v1826_v22 }
 0x212   : > { %v1829_v27 = vmax.f32 %v1667_v24, 0.0  ;;  %4551 = vmatmul.mubr.msk.f32.gmra.mrb[36].mxu0 %vm2438_vm3, %v1827_v21 }
 0x213   : > { %v1828_v28 = vmax.f32 %v1662_v26, 0.0  ;;  %v4354_v29 = vpop.f32.mrb[104].mxu1 }
 0x214   : > { %v1677_v30 = vadd.f32 %v4354_v29, %v5249_v35  ;;  %v1671_v31 = vpop.f32.mrb[105].mxu1 }
 0x215   : > { %v1672_v32 = vadd.f32 %v5249_v35, %v1671_v31  ;;  %4553 = vmatprep.mubr.msk.f32.mxu0 %vm2438_vm3, %v1828_v28 }
 0x216   : > { %v1831_v33 = vmax.f32 %v1677_v30, 0.0  ;;  %4554 = vmatmul.mubr.msk.f32.gmra.mrb[38].mxu0 %vm2438_vm3, %v1829_v27 }
 0x217   : > { %v1830_v34 = vmax.f32 %v1672_v32, 0.0  ;;  %v4357_v36 = vpop.f32.mrb[106].mxu1 }
 0x218   : > { %v1687_v37 = vadd.f32 %v4357_v36, %v5249_v35  ;;  %v1681_v38 = vpop.f32.mrb[107].mxu1 }
 0x219   : > { %v1682_v44 = vadd.f32 %v5249_v35, %v1681_v38  ;;  %4556 = vmatprep.mubr.msk.f32.mxu0 %vm2438_vm3, %v1830_v34 }
 0x21a   : > { %v1833_v39 = vmax.f32 %v1687_v37, 0.0  ;;  %4557 = vmatmul.mubr.msk.f32.gmra.mrb[40].mxu0 %vm2438_vm3, %v1831_v33 }
 0x21b   : > { %v1832_v40 = vmax.f32 %v1682_v44, 0.0  ;;  %v4360_v41 = vpop.f32.mrb[108].mxu1  ;;  %v5382_v44 = vld [vmem:[%s5792_s8] ss:$0 sm:$0xff] }
 0x21c   : > { %v1697_v42 = vadd.f32 %v4360_v41, %v5249_v35  ;;  %v1691_v43 = vpop.f32.mrb[109].mxu1 }
 0x21d   : > { %v1692_v45 = vadd.f32 %v5249_v35, %v1691_v43  ;;  %4559 = vmatprep.mubr.msk.f32.mxu0 %vm2438_vm3, %v1832_v40 }
 0x21e   : > { %v1835_v46 = vmax.f32 %v1697_v42, 0.0  ;;  %4560 = vmatmul.mubr.msk.f32.gmra.mrb[42].mxu0 %vm2438_vm3, %v1833_v39  ;;  %v5389_v42 = vld [vmem:[%s5793_s9] ss:$0 sm:$0xff] }
 0x21f   : > { %v1834_v47 = vmax.f32 %v1692_v45, 0.0  ;;  %v4363_v48 = vpop.f32.mrb[110].mxu1 }
 0x220   : > { %v1707_v49 = vadd.f32 %v4363_v48, %v5249_v35  ;;  %v1701_v50 = vpop.f32.mrb[111].mxu1 }
 0x221   : > { %v1702_v51 = vadd.f32 %v5249_v35, %v1701_v50  ;;  %4562 = vmatprep.mubr.msk.f32.mxu0 %vm2438_vm3, %v1834_v47 }
 0x222   : > { %v1837_v52 = vmax.f32 %v1707_v49, 0.0  ;;  %4563 = vmatmul.mubr.msk.f32.gmra.mrb[44].mxu0 %vm2438_vm3, %v1835_v46 }
 0x223   : > { %v1836_v53 = vmax.f32 %v1702_v51, 0.0  ;;  %v4366_v54 = vpop.f32.mrb[112].mxu1 }
 0x224   : > { %v1717_v55 = vadd.f32 %v4366_v54, %v5249_v35  ;;  %v1711_v56 = vpop.f32.mrb[113].mxu1 }
 0x225   : > { %v1712_v57 = vadd.f32 %v5249_v35, %v1711_v56  ;;  %4565 = vmatprep.mubr.msk.f32.mxu0 %vm2438_vm3, %v1836_v53 }
 0x226   : > { %v1839_v58 = vmax.f32 %v1717_v55, 0.0  ;;  %4566 = vmatmul.mubr.msk.f32.gmra.mrb[46].mxu0 %vm2438_vm3, %v1837_v52 }
 0x227   : > { %v1838_v59 = vmax.f32 %v1712_v57, 0.0  ;;  %v4369_v60 = vpop.f32.mrb[114].mxu1 }
 0x228   : > { %v1727_v61 = vadd.f32 %v4369_v60, %v5249_v35  ;;  %v1721_v62 = vpop.f32.mrb[115].mxu1 }
 0x229   : > { %v1722_v63 = vadd.f32 %v5249_v35, %v1721_v62  ;;  %4568 = vmatprep.mubr.msk.f32.mxu0 %vm2438_vm3, %v1838_v59 }
 0x22a   : > { %v1841_v0 = vmax.f32 %v1727_v61, 0.0  ;;  %4569 = vmatmul.mubr.msk.f32.gmra.mrb[48].mxu0 %vm2438_vm3, %v1839_v58 }
 0x22b   : > { %v1840_v1 = vmax.f32 %v1722_v63, 0.0  ;;  %v4372_v2 = vpop.f32.mrb[116].mxu1 }
 0x22c   : > { %v1737_v3 = vadd.f32 %v4372_v2, %v5249_v35  ;;  %v1731_v4 = vpop.f32.mrb[117].mxu1 }
 0x22d   : > { %v1732_v5 = vadd.f32 %v5249_v35, %v1731_v4  ;;  %4571 = vmatprep.mubr.msk.f32.mxu0 %vm2438_vm3, %v1840_v1 }
 0x22e   : > { %v1843_v6 = vmax.f32 %v1737_v3, 0.0  ;;  %4572 = vmatmul.mubr.msk.f32.gmra.mrb[50].mxu0 %vm2438_vm3, %v1841_v0 }
 0x22f   : > { %v1842_v7 = vmax.f32 %v1732_v5, 0.0  ;;  %v4375_v8 = vpop.f32.mrb[118].mxu1 }
 0x230   : > { %v1747_v9 = vadd.f32 %v4375_v8, %v5249_v35  ;;  %v1741_v10 = vpop.f32.mrb[119].mxu1 }
 0x231   : > { %v1742_v11 = vadd.f32 %v5249_v35, %v1741_v10  ;;  %4574 = vmatprep.mubr.msk.f32.mxu0 %vm2438_vm3, %v1842_v7 }
 0x232   : > { %v1845_v12 = vmax.f32 %v1747_v9, 0.0  ;;  %4575 = vmatmul.mubr.msk.f32.gmra.mrb[52].mxu0 %vm2438_vm3, %v1843_v6 }
 0x233   : > { %v1844_v13 = vmax.f32 %v1742_v11, 0.0  ;;  %v4378_v14 = vpop.f32.mrb[120].mxu1 }
 0x234   : > { %v1757_v15 = vadd.f32 %v4378_v14, %v5249_v35  ;;  %v1751_v16 = vpop.f32.mrb[121].mxu1 }
 0x235   : > { %v1752_v17 = vadd.f32 %v5249_v35, %v1751_v16  ;;  %4577 = vmatprep.mubr.msk.f32.mxu0 %vm2438_vm3, %v1844_v13 }
 0x236   : > { %v1847_v18 = vmax.f32 %v1757_v15, 0.0  ;;  %4578 = vmatmul.mubr.msk.f32.gmra.mrb[54].mxu0 %vm2438_vm3, %v1845_v12 }
 0x237   : > { %v1846_v19 = vmax.f32 %v1752_v17, 0.0  ;;  %v4381_v20 = vpop.f32.mrb[122].mxu1 }
 0x238   : > { %v1767_v21 = vadd.f32 %v4381_v20, %v5249_v35  ;;  %v1761_v22 = vpop.f32.mrb[123].mxu1 }
 0x239   : > { %v1762_v23 = vadd.f32 %v5249_v35, %v1761_v22  ;;  %4580 = vmatprep.mubr.msk.f32.mxu0 %vm2438_vm3, %v1846_v19 }
 0x23a   : > { %v1849_v24 = vmax.f32 %v1767_v21, 0.0  ;;  %4581 = vmatmul.mubr.msk.f32.gmra.mrb[56].mxu0 %vm2438_vm3, %v1847_v18 }
 0x23b   : > { %v1848_v25 = vmax.f32 %v1762_v23, 0.0  ;;  %v4384_v26 = vpop.f32.mrb[124].mxu1 }
 0x23c   : > { %v1777_v27 = vadd.f32 %v4384_v26, %v5249_v35  ;;  %v1771_v28 = vpop.f32.mrb[125].mxu1 }
 0x23d   : > { %v1772_v29 = vadd.f32 %v5249_v35, %v1771_v28  ;;  %4583 = vmatprep.mubr.msk.f32.mxu0 %vm2438_vm3, %v1848_v25 }
 0x23e   : > { %v1851_v30 = vmax.f32 %v1777_v27, 0.0  ;;  %4584 = vmatmul.mubr.msk.f32.gmra.mrb[58].mxu0 %vm2438_vm3, %v1849_v24 }
 0x23f   : > { %v1850_v31 = vmax.f32 %v1772_v29, 0.0  ;;  %v4387_v32 = vpop.f32.mrb[126].mxu1 }
 0x240   : > { %v1787_v33 = vadd.f32 %v4387_v32, %v5249_v35  ;;  %v1781_v34 = vpop.f32.mrb[127].mxu1 }
 0x241   : > { %v1782_v36 = vadd.f32 %v5249_v35, %v1781_v34  ;;  %4586 = vmatprep.mubr.msk.f32.mxu0 %vm2438_vm3, %v1850_v31 }
 0x242   : > { %v1853_v37 = vmax.f32 %v1787_v33, 0.0  ;;  %4587 = vmatmul.mubr.msk.f32.gmra.mrb[60].mxu0 %vm2438_vm3, %v1851_v30 }
 0x243   : > { %v1852_v38 = vmax.f32 %v1782_v36, 0.0 }
 0x245   : > { %4589 = vmatprep.mubr.msk.f32.mxu0 %vm2438_vm3, %v1852_v38 }
 0x246   : > { %4590 = vmatmul.mubr.msk.f32.gmra.mrb[62].mxu0 %vm2438_vm3, %v1853_v37 }
 0x29d   : > { %v4498_v39 = vpop.f32.mrb[0].mxu0 }
 0x29e   : > { %v3024_v40 = vadd.f32 %v4498_v39, %v5382_v44  ;;  %v2697_v41 = vpop.f32.mrb[1].mxu0 }
 0x29f   : > { %v3023_v35 = vadd.f32 %v5382_v44, %v2697_v41 }
 0x2a0   : > { %v3088_v43 = vmax.f32 %v3024_v40, 0.0 }
 0x2a1   : > { %v3087_v45 = vmax.f32 %v3023_v35, 0.0  ;;  %v4501_v46 = vpop.f32.mrb[2].mxu0 }
 0x2a2   : > { %v3026_v47 = vadd.f32 %v4501_v46, %v5382_v44  ;;  %v2707_v48 = vpop.f32.mrb[3].mxu0  ;;  %v3159_v49 = vmul.f32 %v5389_v42, %v3088_v43 }
 0x2a3   : > { %v3025_v50 = vadd.f32 %v5382_v44, %v2707_v48  ;;  %v3158_v53 = vmul.f32 %v5389_v42, %v3087_v45 }
 0x2a4   : > { %v3090_v51 = vmax.f32 %v3026_v47, 0.0  ;;  %v3225_v52 = vsel %vm2438_vm3, %v3159_v49, 0.0 }
 0x2a5   : > { %v3089_v54 = vmax.f32 %v3025_v50, 0.0  ;;  %3226 = vadd.xlane.f32.xlu0 %v3225_v52  ;;  %v4504_v55 = vpop.f32.mrb[4].mxu0  ;;  %v3222_v61 = vsel %vm2438_vm3, %v3158_v53, 0.0 }
 0x2a6   : > { %v3028_v56 = vadd.f32 %v4504_v55, %v5382_v44  ;;  %v2717_v57 = vpop.f32.mrb[5].mxu0  ;;  %v3161_v58 = vmul.f32 %v5389_v42, %v3090_v51 }
 0x2a7   : > { %v3027_v59 = vadd.f32 %v5382_v44, %v2717_v57  ;;  %v3160_v63 = vmul.f32 %v5389_v42, %v3089_v54 }
 0x2a8   : > { %v3092_v60 = vmax.f32 %v3028_v56, 0.0  ;;  %v3231_v62 = vsel %vm2438_vm3, %v3161_v58, 0.0 }
 0x2a9   : > { %v3091_v0 = vmax.f32 %v3027_v59, 0.0  ;;  %3223 = vadd.xlane.f32.xlu0 %v3222_v61  ;;  %3232 = vadd.xlane.f32.xlu1 %v3231_v62  ;;  %v4507_v1 = vpop.f32.mrb[6].mxu0  ;;  %v3228_v7 = vsel %vm2438_vm3, %v3160_v63, 0.0 }
 0x2aa   : > { %v3030_v2 = vadd.f32 %v4507_v1, %v5382_v44  ;;  %v2727_v3 = vpop.f32.mrb[7].mxu0  ;;  %v3163_v8 = vmul.f32 %v5389_v42, %v3092_v60 }
 0x2ab   : > { %v3029_v4 = vadd.f32 %v5382_v44, %v2727_v3  ;;  %v3162_v5 = vmul.f32 %v5389_v42, %v3091_v0 }
 0x2ac   : > { %v3094_v6 = vmax.f32 %v3030_v2, 0.0  ;;  %v3237_v17 = vsel %vm2438_vm3, %v3163_v8, 0.0 }
 0x2ad   : > { %v3093_v9 = vmax.f32 %v3029_v4, 0.0  ;;  %3229 = vadd.xlane.f32.xlu1 %v3228_v7  ;;  %v4510_v10 = vpop.f32.mrb[8].mxu0  ;;  %v3234_v11 = vsel %vm2438_vm3, %v3162_v5, 0.0 }
 0x2ae   : > { %v3032_v12 = vadd.f32 %v4510_v10, %v5382_v44  ;;  %3235 = vadd.xlane.f32.xlu0 %v3234_v11  ;;  %v2737_v13 = vpop.f32.mrb[9].mxu0  ;;  %v3165_v18 = vmul.f32 %v5389_v42, %v3094_v6 }
 0x2af   : > { %v3031_v14 = vadd.f32 %v5382_v44, %v2737_v13  ;;  %v3164_v15 = vmul.f32 %v5389_v42, %v3093_v9 }
 0x2b0   : > { %v3096_v16 = vmax.f32 %v3032_v12, 0.0  ;;  %v3243_v27 = vsel %vm2438_vm3, %v3165_v18, 0.0 }
 0x2b1   : > { %v3095_v19 = vmax.f32 %v3031_v14, 0.0  ;;  %3238 = vadd.xlane.f32.xlu1 %v3237_v17  ;;  %v4513_v20 = vpop.f32.mrb[10].mxu0  ;;  %v3240_v21 = vsel %vm2438_vm3, %v3164_v15, 0.0 }
 0x2b2   : > { %v3034_v22 = vadd.f32 %v4513_v20, %v5382_v44  ;;  %3241 = vadd.xlane.f32.xlu0 %v3240_v21  ;;  %v2747_v23 = vpop.f32.mrb[11].mxu0  ;;  %v3167_v28 = vmul.f32 %v5389_v42, %v3096_v16 }
 0x2b3   : > { %v3033_v24 = vadd.f32 %v5382_v44, %v2747_v23  ;;  %v3166_v25 = vmul.f32 %v5389_v42, %v3095_v19 }
 0x2b4   : > { %v3098_v26 = vmax.f32 %v3034_v22, 0.0  ;;  %v3249_v38 = vsel %vm2438_vm3, %v3167_v28, 0.0 }
 0x2b5   : > { %v3097_v29 = vmax.f32 %v3033_v24, 0.0  ;;  %3244 = vadd.xlane.f32.xlu1 %v3243_v27  ;;  %v4516_v30 = vpop.f32.mrb[12].mxu0  ;;  %v3246_v31 = vsel %vm2438_vm3, %v3166_v25, 0.0 }
 0x2b6   : > { %v3036_v32 = vadd.f32 %v4516_v30, %v5382_v44  ;;  %3247 = vadd.xlane.f32.xlu0 %v3246_v31  ;;  %v2757_v33 = vpop.f32.mrb[13].mxu0  ;;  %v3169_v39 = vmul.f32 %v5389_v42, %v3098_v26 }
 0x2b7   : > { %v3035_v34 = vadd.f32 %v5382_v44, %v2757_v33  ;;  %v3168_v36 = vmul.f32 %v5389_v42, %v3097_v29 }
 0x2b8   : > { %v3100_v37 = vmax.f32 %v3036_v32, 0.0  ;;  %v3255_v49 = vsel %vm2438_vm3, %v3169_v39, 0.0 }
 0x2b9   : > { %v3099_v40 = vmax.f32 %v3035_v34, 0.0  ;;  %3250 = vadd.xlane.f32.xlu1 %v3249_v38  ;;  %v4519_v41 = vpop.f32.mrb[14].mxu0  ;;  %v3252_v35 = vsel %vm2438_vm3, %v3168_v36, 0.0 }
 0x2ba   : > { %v3038_v43 = vadd.f32 %v4519_v41, %v5382_v44  ;;  %3253 = vadd.xlane.f32.xlu0 %v3252_v35  ;;  %v2767_v45 = vpop.f32.mrb[15].mxu0  ;;  %v3171_v50 = vmul.f32 %v5389_v42, %v3100_v37 }
 0x2bb   : > { %v3037_v46 = vadd.f32 %v5382_v44, %v2767_v45  ;;  %v3170_v47 = vmul.f32 %v5389_v42, %v3099_v40 }
 0x2bc   : > { %v3102_v48 = vmax.f32 %v3038_v43, 0.0  ;;  %v3261_v59 = vsel %vm2438_vm3, %v3171_v50, 0.0 }
 0x2bd   : > { %v3101_v51 = vmax.f32 %v3037_v46, 0.0  ;;  %3256 = vadd.xlane.f32.xlu1 %v3255_v49  ;;  %v4522_v52 = vpop.f32.mrb[16].mxu0  ;;  %v3258_v53 = vsel %vm2438_vm3, %v3170_v47, 0.0 }
 0x2be   : > { %v3040_v54 = vadd.f32 %v4522_v52, %v5382_v44  ;;  %3259 = vadd.xlane.f32.xlu0 %v3258_v53  ;;  %v2777_v55 = vpop.f32.mrb[17].mxu0  ;;  %v3173_v60 = vmul.f32 %v5389_v42, %v3102_v48 }
 0x2bf   : > { %v3039_v56 = vadd.f32 %v5382_v44, %v2777_v55  ;;  %v3172_v57 = vmul.f32 %v5389_v42, %v3101_v51 }
 0x2c0   : > { %v3104_v58 = vmax.f32 %v3040_v54, 0.0  ;;  %v3267_v5 = vsel %vm2438_vm3, %v3173_v60, 0.0 }
 0x2c1   : > { %v3103_v61 = vmax.f32 %v3039_v56, 0.0  ;;  %3262 = vadd.xlane.f32.xlu1 %v3261_v59  ;;  %v4525_v62 = vpop.f32.mrb[18].mxu0  ;;  %v3264_v63 = vsel %vm2438_vm3, %v3172_v57, 0.0 }
 0x2c2   : > { %v3042_v0 = vadd.f32 %v4525_v62, %v5382_v44  ;;  %3265 = vadd.xlane.f32.xlu0 %v3264_v63  ;;  %v2787_v1 = vpop.f32.mrb[19].mxu0  ;;  %v3175_v6 = vmul.f32 %v5389_v42, %v3104_v58 }
 0x2c3   : > { %v3041_v2 = vadd.f32 %v5382_v44, %v2787_v1  ;;  %v3174_v3 = vmul.f32 %v5389_v42, %v3103_v61 }
 0x2c4   : > { %v3106_v4 = vmax.f32 %v3042_v0, 0.0  ;;  %v3273_v15 = vsel %vm2438_vm3, %v3175_v6, 0.0 }
 0x2c5   : > { %v3105_v7 = vmax.f32 %v3041_v2, 0.0  ;;  %3268 = vadd.xlane.f32.xlu1 %v3267_v5  ;;  %v4528_v8 = vpop.f32.mrb[20].mxu0  ;;  %v3270_v9 = vsel %vm2438_vm3, %v3174_v3, 0.0 }
 0x2c6   : > { %v3044_v10 = vadd.f32 %v4528_v8, %v5382_v44  ;;  %3271 = vadd.xlane.f32.xlu0 %v3270_v9  ;;  %v2797_v11 = vpop.f32.mrb[21].mxu0  ;;  %v3177_v16 = vmul.f32 %v5389_v42, %v3106_v4 }
 0x2c7   : > { %v3043_v12 = vadd.f32 %v5382_v44, %v2797_v11  ;;  %v3176_v13 = vmul.f32 %v5389_v42, %v3105_v7 }
 0x2c8   : > { %v3108_v14 = vmax.f32 %v3044_v10, 0.0  ;;  %v3279_v25 = vsel %vm2438_vm3, %v3177_v16, 0.0 }
 0x2c9   : > { %v3107_v17 = vmax.f32 %v3043_v12, 0.0  ;;  %3274 = vadd.xlane.f32.xlu1 %v3273_v15  ;;  %v4531_v18 = vpop.f32.mrb[22].mxu0  ;;  %v3276_v19 = vsel %vm2438_vm3, %v3176_v13, 0.0 }
 0x2ca   : > { %v3046_v20 = vadd.f32 %v4531_v18, %v5382_v44  ;;  %3277 = vadd.xlane.f32.xlu0 %v3276_v19  ;;  %v2807_v21 = vpop.f32.mrb[23].mxu0  ;;  %v3179_v26 = vmul.f32 %v5389_v42, %v3108_v14 }
 0x2cb   : > { %v3045_v22 = vadd.f32 %v5382_v44, %v2807_v21  ;;  %v3178_v23 = vmul.f32 %v5389_v42, %v3107_v17 }
 0x2cc   : > { %v3110_v24 = vmax.f32 %v3046_v20, 0.0  ;;  %v3285_v36 = vsel %vm2438_vm3, %v3179_v26, 0.0 }
 0x2cd   : > { %v3109_v27 = vmax.f32 %v3045_v22, 0.0  ;;  %3280 = vadd.xlane.f32.xlu1 %v3279_v25  ;;  %v4534_v28 = vpop.f32.mrb[24].mxu0  ;;  %v3282_v29 = vsel %vm2438_vm3, %v3178_v23, 0.0 }
 0x2ce   : > { %v3048_v30 = vadd.f32 %v4534_v28, %v5382_v44  ;;  %3283 = vadd.xlane.f32.xlu0 %v3282_v29  ;;  %v2817_v31 = vpop.f32.mrb[25].mxu0  ;;  %v3181_v37 = vmul.f32 %v5389_v42, %v3110_v24 }
 0x2cf   : > { %v3047_v32 = vadd.f32 %v5382_v44, %v2817_v31  ;;  %v3180_v33 = vmul.f32 %v5389_v42, %v3109_v27 }
 0x2d0   : > { %v3112_v34 = vmax.f32 %v3048_v30, 0.0  ;;  %v3291_v47 = vsel %vm2438_vm3, %v3181_v37, 0.0 }
 0x2d1   : > { %v3111_v38 = vmax.f32 %v3047_v32, 0.0  ;;  %3286 = vadd.xlane.f32.xlu1 %v3285_v36  ;;  %v4537_v39 = vpop.f32.mrb[26].mxu0  ;;  %v3288_v40 = vsel %vm2438_vm3, %v3180_v33, 0.0 }
 0x2d2   : > { %v3050_v41 = vadd.f32 %v4537_v39, %v5382_v44  ;;  %3289 = vadd.xlane.f32.xlu0 %v3288_v40  ;;  %v2827_v35 = vpop.f32.mrb[27].mxu0  ;;  %v3183_v48 = vmul.f32 %v5389_v42, %v3112_v34 }
 0x2d3   : > { %v3049_v43 = vadd.f32 %v5382_v44, %v2827_v35  ;;  %v3182_v45 = vmul.f32 %v5389_v42, %v3111_v38 }
 0x2d4   : > { %v3114_v46 = vmax.f32 %v3050_v41, 0.0  ;;  %v3297_v57 = vsel %vm2438_vm3, %v3183_v48, 0.0 }
 0x2d5   : > { %v3113_v49 = vmax.f32 %v3049_v43, 0.0  ;;  %3292 = vadd.xlane.f32.xlu1 %v3291_v47  ;;  %v4540_v50 = vpop.f32.mrb[28].mxu0  ;;  %v3294_v51 = vsel %vm2438_vm3, %v3182_v45, 0.0 }
 0x2d6   : > { %v3052_v52 = vadd.f32 %v4540_v50, %v5382_v44  ;;  %3295 = vadd.xlane.f32.xlu0 %v3294_v51  ;;  %v2837_v53 = vpop.f32.mrb[29].mxu0  ;;  %v3185_v58 = vmul.f32 %v5389_v42, %v3114_v46 }
 0x2d7   : > { %v3051_v54 = vadd.f32 %v5382_v44, %v2837_v53  ;;  %v3184_v55 = vmul.f32 %v5389_v42, %v3113_v49 }
 0x2d8   : > { %v3116_v56 = vmax.f32 %v3052_v52, 0.0  ;;  %v3303_v3 = vsel %vm2438_vm3, %v3185_v58, 0.0 }
 0x2d9   : > { %v3115_v59 = vmax.f32 %v3051_v54, 0.0  ;;  %3298 = vadd.xlane.f32.xlu1 %v3297_v57  ;;  %v4543_v60 = vpop.f32.mrb[30].mxu0  ;;  %v3300_v61 = vsel %vm2438_vm3, %v3184_v55, 0.0 }
 0x2da   : > { %v3054_v62 = vadd.f32 %v4543_v60, %v5382_v44  ;;  %3301 = vadd.xlane.f32.xlu0 %v3300_v61  ;;  %v2847_v63 = vpop.f32.mrb[31].mxu0  ;;  %v3187_v4 = vmul.f32 %v5389_v42, %v3116_v56 }
 0x2db   : > { %v3053_v0 = vadd.f32 %v5382_v44, %v2847_v63  ;;  %v3186_v1 = vmul.f32 %v5389_v42, %v3115_v59 }
 0x2dc   : > { %v3118_v2 = vmax.f32 %v3054_v62, 0.0  ;;  %v3309_v13 = vsel %vm2438_vm3, %v3187_v4, 0.0 }
 0x2dd   : > { %v3117_v5 = vmax.f32 %v3053_v0, 0.0  ;;  %3304 = vadd.xlane.f32.xlu1 %v3303_v3  ;;  %v4546_v6 = vpop.f32.mrb[32].mxu0  ;;  %v3306_v7 = vsel %vm2438_vm3, %v3186_v1, 0.0 }
 0x2de   : > { %v3056_v8 = vadd.f32 %v4546_v6, %v5382_v44  ;;  %3307 = vadd.xlane.f32.xlu0 %v3306_v7  ;;  %v2857_v9 = vpop.f32.mrb[33].mxu0  ;;  %v3189_v14 = vmul.f32 %v5389_v42, %v3118_v2 }
 0x2df   : > { %v3055_v10 = vadd.f32 %v5382_v44, %v2857_v9  ;;  %v3188_v11 = vmul.f32 %v5389_v42, %v3117_v5 }
 0x2e0   : > { %v3120_v12 = vmax.f32 %v3056_v8, 0.0  ;;  %v3315_v23 = vsel %vm2438_vm3, %v3189_v14, 0.0 }
 0x2e1   : > { %v3119_v15 = vmax.f32 %v3055_v10, 0.0  ;;  %3310 = vadd.xlane.f32.xlu1 %v3309_v13  ;;  %v4549_v16 = vpop.f32.mrb[34].mxu0  ;;  %v3312_v17 = vsel %vm2438_vm3, %v3188_v11, 0.0 }
 0x2e2   : > { %v3058_v18 = vadd.f32 %v4549_v16, %v5382_v44  ;;  %3313 = vadd.xlane.f32.xlu0 %v3312_v17  ;;  %v2867_v19 = vpop.f32.mrb[35].mxu0  ;;  %v3191_v24 = vmul.f32 %v5389_v42, %v3120_v12 }
 0x2e3   : > { %v3057_v20 = vadd.f32 %v5382_v44, %v2867_v19  ;;  %v3190_v21 = vmul.f32 %v5389_v42, %v3119_v15 }
 0x2e4   : > { %v3122_v22 = vmax.f32 %v3058_v18, 0.0  ;;  %v3321_v33 = vsel %vm2438_vm3, %v3191_v24, 0.0 }
 0x2e5   : > { %v3121_v25 = vmax.f32 %v3057_v20, 0.0  ;;  %3316 = vadd.xlane.f32.xlu1 %v3315_v23  ;;  %v4552_v26 = vpop.f32.mrb[36].mxu0  ;;  %v3318_v27 = vsel %vm2438_vm3, %v3190_v21, 0.0 }
 0x2e6   : > { %v3060_v28 = vadd.f32 %v4552_v26, %v5382_v44  ;;  %3319 = vadd.xlane.f32.xlu0 %v3318_v27  ;;  %v2877_v29 = vpop.f32.mrb[37].mxu0  ;;  %v3193_v34 = vmul.f32 %v5389_v42, %v3122_v22 }
 0x2e7   : > { %v3059_v30 = vadd.f32 %v5382_v44, %v2877_v29  ;;  %v3192_v31 = vmul.f32 %v5389_v42, %v3121_v25 }
 0x2e8   : > { %v3124_v32 = vmax.f32 %v3060_v28, 0.0  ;;  %v3327_v45 = vsel %vm2438_vm3, %v3193_v34, 0.0 }
 0x2e9   : > { %v3123_v36 = vmax.f32 %v3059_v30, 0.0  ;;  %3322 = vadd.xlane.f32.xlu1 %v3321_v33  ;;  %v4555_v37 = vpop.f32.mrb[38].mxu0  ;;  %v3324_v38 = vsel %vm2438_vm3, %v3192_v31, 0.0 }
 0x2ea   : > { %v3062_v39 = vadd.f32 %v4555_v37, %v5382_v44  ;;  %3325 = vadd.xlane.f32.xlu0 %v3324_v38  ;;  %v2887_v40 = vpop.f32.mrb[39].mxu0  ;;  %v3195_v46 = vmul.f32 %v5389_v42, %v3124_v32 }
 0x2eb   : > { %v3061_v41 = vadd.f32 %v5382_v44, %v2887_v40  ;;  %v3194_v35 = vmul.f32 %v5389_v42, %v3123_v36 }
 0x2ec   : > { %v3126_v43 = vmax.f32 %v3062_v39, 0.0  ;;  %v3333_v55 = vsel %vm2438_vm3, %v3195_v46, 0.0 }
 0x2ed   : > { %v3125_v47 = vmax.f32 %v3061_v41, 0.0  ;;  %3328 = vadd.xlane.f32.xlu1 %v3327_v45  ;;  %v4558_v48 = vpop.f32.mrb[40].mxu0  ;;  %v3330_v49 = vsel %vm2438_vm3, %v3194_v35, 0.0 }
 0x2ee   : > { %v3064_v50 = vadd.f32 %v4558_v48, %v5382_v44  ;;  %3331 = vadd.xlane.f32.xlu0 %v3330_v49  ;;  %v2897_v51 = vpop.f32.mrb[41].mxu0  ;;  %v3197_v56 = vmul.f32 %v5389_v42, %v3126_v43 }
 0x2ef   : > { %v3063_v52 = vadd.f32 %v5382_v44, %v2897_v51  ;;  %v3196_v53 = vmul.f32 %v5389_v42, %v3125_v47 }
 0x2f0   : > { %v3128_v54 = vmax.f32 %v3064_v50, 0.0  ;;  %v3339_v1 = vsel %vm2438_vm3, %v3197_v56, 0.0 }
 0x2f1   : > { %v3127_v57 = vmax.f32 %v3063_v52, 0.0  ;;  %3334 = vadd.xlane.f32.xlu1 %v3333_v55  ;;  %v4561_v58 = vpop.f32.mrb[42].mxu0  ;;  %v3336_v59 = vsel %vm2438_vm3, %v3196_v53, 0.0 }
 0x2f2   : > { %v3066_v60 = vadd.f32 %v4561_v58, %v5382_v44  ;;  %3337 = vadd.xlane.f32.xlu0 %v3336_v59  ;;  %v2907_v61 = vpop.f32.mrb[43].mxu0  ;;  %v3199_v2 = vmul.f32 %v5389_v42, %v3128_v54 }
 0x2f3   : > { %v3065_v62 = vadd.f32 %v5382_v44, %v2907_v61  ;;  %v3198_v63 = vmul.f32 %v5389_v42, %v3127_v57 }
 0x2f4   : > { %v3130_v0 = vmax.f32 %v3066_v60, 0.0  ;;  %v3345_v11 = vsel %vm2438_vm3, %v3199_v2, 0.0 }
 0x2f5   : > { %v3129_v3 = vmax.f32 %v3065_v62, 0.0  ;;  %3340 = vadd.xlane.f32.xlu1 %v3339_v1  ;;  %v4564_v4 = vpop.f32.mrb[44].mxu0  ;;  %v3342_v5 = vsel %vm2438_vm3, %v3198_v63, 0.0 }
 0x2f6   : > { %v3068_v6 = vadd.f32 %v4564_v4, %v5382_v44  ;;  %3343 = vadd.xlane.f32.xlu0 %v3342_v5  ;;  %v2917_v7 = vpop.f32.mrb[45].mxu0  ;;  %v3201_v12 = vmul.f32 %v5389_v42, %v3130_v0 }
 0x2f7   : > { %v3067_v8 = vadd.f32 %v5382_v44, %v2917_v7  ;;  %v3200_v9 = vmul.f32 %v5389_v42, %v3129_v3 }
 0x2f8   : > { %v3132_v10 = vmax.f32 %v3068_v6, 0.0  ;;  %v3351_v21 = vsel %vm2438_vm3, %v3201_v12, 0.0 }
 0x2f9   : > { %v3131_v13 = vmax.f32 %v3067_v8, 0.0  ;;  %3346 = vadd.xlane.f32.xlu1 %v3345_v11  ;;  %v4567_v14 = vpop.f32.mrb[46].mxu0  ;;  %v3348_v15 = vsel %vm2438_vm3, %v3200_v9, 0.0 }
 0x2fa   : > { %v3070_v16 = vadd.f32 %v4567_v14, %v5382_v44  ;;  %3349 = vadd.xlane.f32.xlu0 %v3348_v15  ;;  %v2927_v17 = vpop.f32.mrb[47].mxu0  ;;  %v3203_v22 = vmul.f32 %v5389_v42, %v3132_v10 }
 0x2fb   : > { %v3069_v18 = vadd.f32 %v5382_v44, %v2927_v17  ;;  %v3202_v19 = vmul.f32 %v5389_v42, %v3131_v13 }
 0x2fc   : > { %v3134_v20 = vmax.f32 %v3070_v16, 0.0  ;;  %v3357_v31 = vsel %vm2438_vm3, %v3203_v22, 0.0 }
 0x2fd   : > { %v3133_v23 = vmax.f32 %v3069_v18, 0.0  ;;  %3352 = vadd.xlane.f32.xlu1 %v3351_v21  ;;  %v4570_v24 = vpop.f32.mrb[48].mxu0  ;;  %v3354_v25 = vsel %vm2438_vm3, %v3202_v19, 0.0 }
 0x2fe   : > { %v3072_v26 = vadd.f32 %v4570_v24, %v5382_v44  ;;  %3355 = vadd.xlane.f32.xlu0 %v3354_v25  ;;  %v2937_v27 = vpop.f32.mrb[49].mxu0  ;;  %v3205_v32 = vmul.f32 %v5389_v42, %v3134_v20 }
 0x2ff   : > { %v3071_v28 = vadd.f32 %v5382_v44, %v2937_v27  ;;  %v3204_v29 = vmul.f32 %v5389_v42, %v3133_v23 }
 0x300   : > { %v3136_v30 = vmax.f32 %v3072_v26, 0.0  ;;  %v3363_v35 = vsel %vm2438_vm3, %v3205_v32, 0.0 }
 0x301   : > { %v3135_v33 = vmax.f32 %v3071_v28, 0.0  ;;  %3358 = vadd.xlane.f32.xlu1 %v3357_v31  ;;  %v4573_v34 = vpop.f32.mrb[50].mxu0  ;;  %v3360_v36 = vsel %vm2438_vm3, %v3204_v29, 0.0 }
 0x302   : > { %v3074_v37 = vadd.f32 %v4573_v34, %v5382_v44  ;;  %3361 = vadd.xlane.f32.xlu0 %v3360_v36  ;;  %v2947_v38 = vpop.f32.mrb[51].mxu0  ;;  %v3207_v43 = vmul.f32 %v5389_v42, %v3136_v30 }
 0x303   : > { %v3073_v39 = vadd.f32 %v5382_v44, %v2947_v38  ;;  %v3206_v40 = vmul.f32 %v5389_v42, %v3135_v33 }
 0x304   : > { %v3138_v41 = vmax.f32 %v3074_v37, 0.0  ;;  %v3369_v53 = vsel %vm2438_vm3, %v3207_v43, 0.0 }
 0x305   : > { %v3137_v45 = vmax.f32 %v3073_v39, 0.0  ;;  %3364 = vadd.xlane.f32.xlu1 %v3363_v35  ;;  %v4576_v46 = vpop.f32.mrb[52].mxu0  ;;  %v3366_v47 = vsel %vm2438_vm3, %v3206_v40, 0.0 }
 0x306   : > { %v3076_v48 = vadd.f32 %v4576_v46, %v5382_v44  ;;  %3367 = vadd.xlane.f32.xlu0 %v3366_v47  ;;  %v2957_v49 = vpop.f32.mrb[53].mxu0  ;;  %v3209_v54 = vmul.f32 %v5389_v42, %v3138_v41 }
 0x307   : > { %v3075_v50 = vadd.f32 %v5382_v44, %v2957_v49  ;;  %v3208_v51 = vmul.f32 %v5389_v42, %v3137_v45  ;;  %v5581_v49 = vld [vmem:[#allocation2] ss:$0 sm:$0xff] }
 0x308   : > { %v3140_v52 = vmax.f32 %v3076_v48, 0.0  ;;  %v3375_v63 = vsel %vm2438_vm3, %v3209_v54, 0.0 }
 0x309   : > { %v3139_v55 = vmax.f32 %v3075_v50, 0.0  ;;  %3370 = vadd.xlane.f32.xlu1 %v3369_v53  ;;  %v4579_v56 = vpop.f32.mrb[54].mxu0  ;;  %v3372_v57 = vsel %vm2438_vm3, %v3208_v51, 0.0 }
 0x30a   : > { %v3078_v58 = vadd.f32 %v4579_v56, %v5382_v44  ;;  %3373 = vadd.xlane.f32.xlu0 %v3372_v57  ;;  %v2967_v59 = vpop.f32.mrb[55].mxu0  ;;  %v3211_v0 = vmul.f32 %v5389_v42, %v3140_v52 }
 0x30b   : > { %v3077_v60 = vadd.f32 %v5382_v44, %v2967_v59  ;;  %v3210_v61 = vmul.f32 %v5389_v42, %v3139_v55 }
 0x30c   : > { %v3142_v62 = vmax.f32 %v3078_v58, 0.0  ;;  %v3381_v9 = vsel %vm2438_vm3, %v3211_v0, 0.0 }
 0x30d   : > { %v3141_v1 = vmax.f32 %v3077_v60, 0.0  ;;  %3376 = vadd.xlane.f32.xlu1 %v3375_v63  ;;  %v4582_v2 = vpop.f32.mrb[56].mxu0  ;;  %v3378_v3 = vsel %vm2438_vm3, %v3210_v61, 0.0 }
 0x30e   : > { %v3080_v4 = vadd.f32 %v4582_v2, %v5382_v44  ;;  %3379 = vadd.xlane.f32.xlu0 %v3378_v3  ;;  %v2977_v5 = vpop.f32.mrb[57].mxu0  ;;  %v3213_v10 = vmul.f32 %v5389_v42, %v3142_v62 }
 0x30f   : > { %v3079_v6 = vadd.f32 %v5382_v44, %v2977_v5  ;;  %v3212_v7 = vmul.f32 %v5389_v42, %v3141_v1 }
 0x310   : > { %v3144_v8 = vmax.f32 %v3080_v4, 0.0  ;;  %v3387_v19 = vsel %vm2438_vm3, %v3213_v10, 0.0 }
 0x311   : > { %v3143_v11 = vmax.f32 %v3079_v6, 0.0  ;;  %3382 = vadd.xlane.f32.xlu1 %v3381_v9  ;;  %v4585_v12 = vpop.f32.mrb[58].mxu0  ;;  %v3384_v13 = vsel %vm2438_vm3, %v3212_v7, 0.0 }
 0x312   : > { %v3082_v14 = vadd.f32 %v4585_v12, %v5382_v44  ;;  %3385 = vadd.xlane.f32.xlu0 %v3384_v13  ;;  %v2987_v15 = vpop.f32.mrb[59].mxu0  ;;  %v3215_v20 = vmul.f32 %v5389_v42, %v3144_v8 }
 0x313   : > { %v3081_v16 = vadd.f32 %v5382_v44, %v2987_v15  ;;  %v3214_v17 = vmul.f32 %v5389_v42, %v3143_v11 }
 0x314   : > { %v3146_v18 = vmax.f32 %v3082_v14, 0.0  ;;  %v3393_v29 = vsel %vm2438_vm3, %v3215_v20, 0.0 }
 0x315   : > { %v3145_v21 = vmax.f32 %v3081_v16, 0.0  ;;  %3388 = vadd.xlane.f32.xlu1 %v3387_v19  ;;  %v4588_v22 = vpop.f32.mrb[60].mxu0  ;;  %v3390_v23 = vsel %vm2438_vm3, %v3214_v17, 0.0 }
 0x316   : > { %v3084_v24 = vadd.f32 %v4588_v22, %v5382_v44  ;;  %3391 = vadd.xlane.f32.xlu0 %v3390_v23  ;;  %v2997_v25 = vpop.f32.mrb[61].mxu0  ;;  %v3217_v30 = vmul.f32 %v5389_v42, %v3146_v18 }
 0x317   : > { %v3083_v26 = vadd.f32 %v5382_v44, %v2997_v25  ;;  %v3216_v27 = vmul.f32 %v5389_v42, %v3145_v21 }
 0x318   : > { %v3148_v28 = vmax.f32 %v3084_v24, 0.0  ;;  %v3399_v40 = vsel %vm2438_vm3, %v3217_v30, 0.0 }
 0x319   : > { %v3147_v31 = vmax.f32 %v3083_v26, 0.0  ;;  %3394 = vadd.xlane.f32.xlu1 %v3393_v29  ;;  %v4591_v32 = vpop.f32.mrb[62].mxu0  ;;  %v3396_v33 = vsel %vm2438_vm3, %v3216_v27, 0.0 }
 0x31a   : > { %v3086_v34 = vadd.f32 %v4591_v32, %v5382_v44  ;;  %3397 = vadd.xlane.f32.xlu0 %v3396_v33  ;;  %v3007_v36 = vpop.f32.mrb[63].mxu0  ;;  %v3219_v41 = vmul.f32 %v5389_v42, %v3148_v28 }
 0x31b   : > { %v3085_v37 = vadd.f32 %v5382_v44, %v3007_v36  ;;  %v3218_v38 = vmul.f32 %v5389_v42, %v3147_v31 }
 0x31c   : > { %v3150_v39 = vmax.f32 %v3086_v34, 0.0  ;;  %v3405_v46 = vsel %vm2438_vm3, %v3219_v41, 0.0 }
 0x31d   : > { %v3149_v35 = vmax.f32 %v3085_v37, 0.0  ;;  %3400 = vadd.xlane.f32.xlu1 %v3399_v40  ;;  %v3402_v43 = vsel %vm2438_vm3, %v3218_v38, 0.0 }
 0x31e   : > { %3403 = vadd.xlane.f32.xlu0 %v3402_v43  ;;  %v3221_v47 = vmul.f32 %v5389_v42, %v3150_v39 }
 0x31f   : > { %v3220_v45 = vmul.f32 %v5389_v42, %v3149_v35 }
 0x320   : > { %v3411_v48 = vsel %vm2438_vm3, %v3221_v47, 0.0 }
 0x321   : > { %3406 = vadd.xlane.f32.xlu1 %v3405_v46  ;;  %v3408_v44 = vsel %vm2438_vm3, %v3220_v45, 0.0 }
 0x322   : > { %3409 = vadd.xlane.f32.xlu0 %v3408_v44 }
 0x325   : > { %3412 = vadd.xlane.f32.xlu1 %v3411_v48 }
 0x332   : > { %v3227_v42 = vpop.xlane.xlu0 %3226 }
 0x333   : > { %v3422_v50 = vadd.f32 %v5581_v49, %v3227_v42 }
 0x335   : > { %3487 = vst.msk [vmem:[%s5587_s17 + $0x8] sm:$0xff] %vm3485_vm4, %v3422_v50 }
 0x336   : > { %v3224_v51 = vpop.xlane.xlu0 %3223  ;;  %v3233_v52 = vpop.xlane.xlu1 %3232 }
 0x337   : > { %v3421_v53 = vadd.f32 %v5581_v49, %v3224_v51  ;;  %v3424_v54 = vadd.f32 %v5581_v49, %v3233_v52 }
 0x339   : > { %3486 = vst.msk [vmem:[%s5587_s17] sm:$0xff] %vm3485_vm4, %v3421_v53  ;;  %3489 = vst.msk [vmem:[%s5587_s17 + $0x18] sm:$0xff] %vm3485_vm4, %v3424_v54 }
 0x33a   : > { %v3230_v55 = vpop.xlane.xlu1 %3229 }
 0x33b   : > { %v3423_v56 = vadd.f32 %v5581_v49, %v3230_v55  ;;  %v3236_v57 = vpop.xlane.xlu0 %3235 }
 0x33c   : > { %v3425_v58 = vadd.f32 %v5581_v49, %v3236_v57 }
 0x33d   : > { %3488 = vst.msk [vmem:[%s5587_s17 + $0x10] sm:$0xff] %vm3485_vm4, %v3423_v56 }
 0x33e   : > { %3490 = vst.msk [vmem:[%s5587_s17 + $0x20] sm:$0xff] %vm3485_vm4, %v3425_v58  ;;  %v3239_v59 = vpop.xlane.xlu1 %3238 }
 0x33f   : > { %v3426_v60 = vadd.f32 %v5581_v49, %v3239_v59  ;;  %v3242_v61 = vpop.xlane.xlu0 %3241 }
 0x340   : > { %v3427_v62 = vadd.f32 %v5581_v49, %v3242_v61 }
 0x341   : > { %3491 = vst.msk [vmem:[%s5587_s17 + $0x28] sm:$0xff] %vm3485_vm4, %v3426_v60 }
 0x342   : > { %3492 = vst.msk [vmem:[%s5587_s17 + $0x30] sm:$0xff] %vm3485_vm4, %v3427_v62  ;;  %v3245_v63 = vpop.xlane.xlu1 %3244 }
 0x343   : > { %v3428_v0 = vadd.f32 %v5581_v49, %v3245_v63  ;;  %v3248_v1 = vpop.xlane.xlu0 %3247 }
 0x344   : > { %v3429_v2 = vadd.f32 %v5581_v49, %v3248_v1 }
 0x345   : > { %3493 = vst.msk [vmem:[%s5587_s17 + $0x38] sm:$0xff] %vm3485_vm4, %v3428_v0 }
 0x346   : > { %3494 = vst.msk [vmem:[%s5587_s17 + $0x40] sm:$0xff] %vm3485_vm4, %v3429_v2  ;;  %v3251_v3 = vpop.xlane.xlu1 %3250 }
 0x347   : > { %v3430_v4 = vadd.f32 %v5581_v49, %v3251_v3  ;;  %v3254_v5 = vpop.xlane.xlu0 %3253 }
 0x348   : > { %v3431_v6 = vadd.f32 %v5581_v49, %v3254_v5 }
 0x349   : > { %3495 = vst.msk [vmem:[%s5587_s17 + $0x48] sm:$0xff] %vm3485_vm4, %v3430_v4 }
 0x34a   : > { %3496 = vst.msk [vmem:[%s5587_s17 + $0x50] sm:$0xff] %vm3485_vm4, %v3431_v6  ;;  %v3257_v7 = vpop.xlane.xlu1 %3256 }
 0x34b   : > { %v3432_v8 = vadd.f32 %v5581_v49, %v3257_v7  ;;  %v3260_v9 = vpop.xlane.xlu0 %3259 }
 0x34c   : > { %v3433_v10 = vadd.f32 %v5581_v49, %v3260_v9 }
 0x34d   : > { %3497 = vst.msk [vmem:[%s5587_s17 + $0x58] sm:$0xff] %vm3485_vm4, %v3432_v8 }
 0x34e   : > { %3498 = vst.msk [vmem:[%s5587_s17 + $0x60] sm:$0xff] %vm3485_vm4, %v3433_v10  ;;  %v3263_v11 = vpop.xlane.xlu1 %3262 }
 0x34f   : > { %v3434_v12 = vadd.f32 %v5581_v49, %v3263_v11  ;;  %v3266_v13 = vpop.xlane.xlu0 %3265 }
 0x350   : > { %v3435_v14 = vadd.f32 %v5581_v49, %v3266_v13 }
 0x351   : > { %3499 = vst.msk [vmem:[%s5587_s17 + $0x68] sm:$0xff] %vm3485_vm4, %v3434_v12 }
 0x352   : > { %3500 = vst.msk [vmem:[%s5587_s17 + $0x70] sm:$0xff] %vm3485_vm4, %v3435_v14  ;;  %v3269_v15 = vpop.xlane.xlu1 %3268 }
 0x353   : > { %v3436_v16 = vadd.f32 %v5581_v49, %v3269_v15  ;;  %v3272_v17 = vpop.xlane.xlu0 %3271 }
 0x354   : > { %v3437_v18 = vadd.f32 %v5581_v49, %v3272_v17 }
 0x355   : > { %3501 = vst.msk [vmem:[%s5587_s17 + $0x78] sm:$0xff] %vm3485_vm4, %v3436_v16 }
 0x356   : > { %3502 = vst.msk [vmem:[%s5587_s17 + $0x80] sm:$0xff] %vm3485_vm4, %v3437_v18  ;;  %v3275_v19 = vpop.xlane.xlu1 %3274 }
 0x357   : > { %v3438_v20 = vadd.f32 %v5581_v49, %v3275_v19  ;;  %v3278_v21 = vpop.xlane.xlu0 %3277 }
 0x358   : > { %v3439_v22 = vadd.f32 %v5581_v49, %v3278_v21 }
 0x359   : > { %3503 = vst.msk [vmem:[%s5587_s17 + $0x88] sm:$0xff] %vm3485_vm4, %v3438_v20 }
 0x35a   : > { %3504 = vst.msk [vmem:[%s5587_s17 + $0x90] sm:$0xff] %vm3485_vm4, %v3439_v22  ;;  %v3281_v23 = vpop.xlane.xlu1 %3280 }
 0x35b   : > { %v3440_v24 = vadd.f32 %v5581_v49, %v3281_v23  ;;  %v3284_v25 = vpop.xlane.xlu0 %3283 }
 0x35c   : > { %v3441_v26 = vadd.f32 %v5581_v49, %v3284_v25 }
 0x35d   : > { %3505 = vst.msk [vmem:[%s5587_s17 + $0x98] sm:$0xff] %vm3485_vm4, %v3440_v24 }
 0x35e   : > { %3506 = vst.msk [vmem:[%s5587_s17 + $0xa0] sm:$0xff] %vm3485_vm4, %v3441_v26  ;;  %v3287_v27 = vpop.xlane.xlu1 %3286 }
 0x35f   : > { %v3442_v28 = vadd.f32 %v5581_v49, %v3287_v27  ;;  %v3290_v29 = vpop.xlane.xlu0 %3289 }
 0x360   : > { %v3443_v30 = vadd.f32 %v5581_v49, %v3290_v29 }
 0x361   : > { %3507 = vst.msk [vmem:[%s5587_s17 + $0xa8] sm:$0xff] %vm3485_vm4, %v3442_v28 }
 0x362   : > { %3508 = vst.msk [vmem:[%s5587_s17 + $0xb0] sm:$0xff] %vm3485_vm4, %v3443_v30  ;;  %v3293_v31 = vpop.xlane.xlu1 %3292 }
 0x363   : > { %v3444_v32 = vadd.f32 %v5581_v49, %v3293_v31  ;;  %v3296_v33 = vpop.xlane.xlu0 %3295 }
 0x364   : > { %v3445_v34 = vadd.f32 %v5581_v49, %v3296_v33 }
 0x365   : > { %3509 = vst.msk [vmem:[%s5587_s17 + $0xb8] sm:$0xff] %vm3485_vm4, %v3444_v32 }
 0x366   : > { %3510 = vst.msk [vmem:[%s5587_s17 + $0xc0] sm:$0xff] %vm3485_vm4, %v3445_v34  ;;  %v3299_v36 = vpop.xlane.xlu1 %3298 }
 0x367   : > { %v3446_v37 = vadd.f32 %v5581_v49, %v3299_v36  ;;  %v3302_v38 = vpop.xlane.xlu0 %3301 }
 0x368   : > { %v3447_v39 = vadd.f32 %v5581_v49, %v3302_v38 }
 0x369   : > { %3511 = vst.msk [vmem:[%s5587_s17 + $0xc8] sm:$0xff] %vm3485_vm4, %v3446_v37 }
 0x36a   : > { %3512 = vst.msk [vmem:[%s5587_s17 + $0xd0] sm:$0xff] %vm3485_vm4, %v3447_v39  ;;  %v3305_v40 = vpop.xlane.xlu1 %3304 }
 0x36b   : > { %v3448_v41 = vadd.f32 %v5581_v49, %v3305_v40  ;;  %v3308_v35 = vpop.xlane.xlu0 %3307 }
 0x36c   : > { %v3449_v43 = vadd.f32 %v5581_v49, %v3308_v35 }
 0x36d   : > { %3513 = vst.msk [vmem:[%s5587_s17 + $0xd8] sm:$0xff] %vm3485_vm4, %v3448_v41 }
 0x36e   : > { %3514 = vst.msk [vmem:[%s5587_s17 + $0xe0] sm:$0xff] %vm3485_vm4, %v3449_v43  ;;  %v3311_v45 = vpop.xlane.xlu1 %3310 }
 0x36f   : > { %v3450_v46 = vadd.f32 %v5581_v49, %v3311_v45  ;;  %v3314_v47 = vpop.xlane.xlu0 %3313 }
 0x370   : > { %v3451_v44 = vadd.f32 %v5581_v49, %v3314_v47 }
 0x371   : > { %3515 = vst.msk [vmem:[%s5587_s17 + $0xe8] sm:$0xff] %vm3485_vm4, %v3450_v46 }
 0x372   : > { %3516 = vst.msk [vmem:[%s5587_s17 + $0xf0] sm:$0xff] %vm3485_vm4, %v3451_v44  ;;  %v3317_v48 = vpop.xlane.xlu1 %3316 }
 0x373   : > { %v3452_v42 = vadd.f32 %v5581_v49, %v3317_v48  ;;  %v3320_v50 = vpop.xlane.xlu0 %3319 }
 0x374   : > { %v3453_v51 = vadd.f32 %v5581_v49, %v3320_v50 }
 0x375   : > { %3517 = vst.msk [vmem:[%s5587_s17 + $0xf8] sm:$0xff] %vm3485_vm4, %v3452_v42 }
 0x376   : > { %3518 = vst.msk [vmem:[%s5587_s17 + $0x100] sm:$0xff] %vm3485_vm4, %v3453_v51  ;;  %v3323_v52 = vpop.xlane.xlu1 %3322 }
 0x377   : > { %v3454_v53 = vadd.f32 %v5581_v49, %v3323_v52  ;;  %v3326_v54 = vpop.xlane.xlu0 %3325 }
 0x378   : > { %v3455_v55 = vadd.f32 %v5581_v49, %v3326_v54 }
 0x379   : > { %3519 = vst.msk [vmem:[%s5587_s17 + $0x108] sm:$0xff] %vm3485_vm4, %v3454_v53 }
 0x37a   : > { %3520 = vst.msk [vmem:[%s5587_s17 + $0x110] sm:$0xff] %vm3485_vm4, %v3455_v55  ;;  %v3329_v56 = vpop.xlane.xlu1 %3328 }
 0x37b   : > { %v3456_v57 = vadd.f32 %v5581_v49, %v3329_v56  ;;  %v3332_v58 = vpop.xlane.xlu0 %3331 }
 0x37c   : > { %v3457_v59 = vadd.f32 %v5581_v49, %v3332_v58 }
 0x37d   : > { %3521 = vst.msk [vmem:[%s5587_s17 + $0x118] sm:$0xff] %vm3485_vm4, %v3456_v57 }
 0x37e   : > { %3522 = vst.msk [vmem:[%s5587_s17 + $0x120] sm:$0xff] %vm3485_vm4, %v3457_v59  ;;  %v3335_v60 = vpop.xlane.xlu1 %3334 }
 0x37f   : > { %v3458_v61 = vadd.f32 %v5581_v49, %v3335_v60  ;;  %v3338_v62 = vpop.xlane.xlu0 %3337 }
 0x380   : > { %v3459_v63 = vadd.f32 %v5581_v49, %v3338_v62 }
 0x381   : > { %3523 = vst.msk [vmem:[%s5587_s17 + $0x128] sm:$0xff] %vm3485_vm4, %v3458_v61 }
 0x382   : > { %3524 = vst.msk [vmem:[%s5587_s17 + $0x130] sm:$0xff] %vm3485_vm4, %v3459_v63  ;;  %v3341_v0 = vpop.xlane.xlu1 %3340 }
 0x383   : > { %v3460_v1 = vadd.f32 %v5581_v49, %v3341_v0  ;;  %v3344_v2 = vpop.xlane.xlu0 %3343 }
 0x384   : > { %v3461_v3 = vadd.f32 %v5581_v49, %v3344_v2 }
 0x385   : > { %3525 = vst.msk [vmem:[%s5587_s17 + $0x138] sm:$0xff] %vm3485_vm4, %v3460_v1 }
 0x386   : > { %3526 = vst.msk [vmem:[%s5587_s17 + $0x140] sm:$0xff] %vm3485_vm4, %v3461_v3  ;;  %v3347_v4 = vpop.xlane.xlu1 %3346 }
 0x387   : > { %v3462_v5 = vadd.f32 %v5581_v49, %v3347_v4  ;;  %v3350_v6 = vpop.xlane.xlu0 %3349 }
 0x388   : > { %v3463_v7 = vadd.f32 %v5581_v49, %v3350_v6 }
 0x389   : > { %3527 = vst.msk [vmem:[%s5587_s17 + $0x148] sm:$0xff] %vm3485_vm4, %v3462_v5 }
 0x38a   : > { %3528 = vst.msk [vmem:[%s5587_s17 + $0x150] sm:$0xff] %vm3485_vm4, %v3463_v7  ;;  %v3353_v8 = vpop.xlane.xlu1 %3352 }
 0x38b   : > { %v3464_v9 = vadd.f32 %v5581_v49, %v3353_v8  ;;  %v3356_v10 = vpop.xlane.xlu0 %3355 }
 0x38c   : > { %v3465_v11 = vadd.f32 %v5581_v49, %v3356_v10 }
 0x38d   : > { %3529 = vst.msk [vmem:[%s5587_s17 + $0x158] sm:$0xff] %vm3485_vm4, %v3464_v9 }
 0x38e   : > { %3530 = vst.msk [vmem:[%s5587_s17 + $0x160] sm:$0xff] %vm3485_vm4, %v3465_v11  ;;  %v3359_v12 = vpop.xlane.xlu1 %3358 }
 0x38f   : > { %v3466_v13 = vadd.f32 %v5581_v49, %v3359_v12  ;;  %v3362_v14 = vpop.xlane.xlu0 %3361 }
 0x390   : > { %v3467_v15 = vadd.f32 %v5581_v49, %v3362_v14 }
 0x391   : > { %3531 = vst.msk [vmem:[%s5587_s17 + $0x168] sm:$0xff] %vm3485_vm4, %v3466_v13 }
 0x392   : > { %3532 = vst.msk [vmem:[%s5587_s17 + $0x170] sm:$0xff] %vm3485_vm4, %v3467_v15  ;;  %v3365_v16 = vpop.xlane.xlu1 %3364 }
 0x393   : > { %v3468_v17 = vadd.f32 %v5581_v49, %v3365_v16  ;;  %v3368_v18 = vpop.xlane.xlu0 %3367 }
 0x394   : > { %v3469_v19 = vadd.f32 %v5581_v49, %v3368_v18 }
 0x395   : > { %3533 = vst.msk [vmem:[%s5587_s17 + $0x178] sm:$0xff] %vm3485_vm4, %v3468_v17 }
 0x396   : > { %3534 = vst.msk [vmem:[%s5587_s17 + $0x180] sm:$0xff] %vm3485_vm4, %v3469_v19  ;;  %v3371_v20 = vpop.xlane.xlu1 %3370 }
 0x397   : > { %v3470_v21 = vadd.f32 %v5581_v49, %v3371_v20  ;;  %v3374_v22 = vpop.xlane.xlu0 %3373 }
 0x398   : > { %v3471_v23 = vadd.f32 %v5581_v49, %v3374_v22 }
 0x399   : > { %3535 = vst.msk [vmem:[%s5587_s17 + $0x188] sm:$0xff] %vm3485_vm4, %v3470_v21 }
 0x39a   : > { %3536 = vst.msk [vmem:[%s5587_s17 + $0x190] sm:$0xff] %vm3485_vm4, %v3471_v23  ;;  %v3377_v24 = vpop.xlane.xlu1 %3376 }
 0x39b   : > { %v3472_v25 = vadd.f32 %v5581_v49, %v3377_v24  ;;  %v3380_v26 = vpop.xlane.xlu0 %3379 }
 0x39c   : > { %v3473_v27 = vadd.f32 %v5581_v49, %v3380_v26 }
 0x39d   : > { %3537 = vst.msk [vmem:[%s5587_s17 + $0x198] sm:$0xff] %vm3485_vm4, %v3472_v25 }
 0x39e   : > { %3538 = vst.msk [vmem:[%s5587_s17 + $0x1a0] sm:$0xff] %vm3485_vm4, %v3473_v27  ;;  %v3383_v28 = vpop.xlane.xlu1 %3382 }
 0x39f   : > { %v3474_v29 = vadd.f32 %v5581_v49, %v3383_v28  ;;  %v3386_v30 = vpop.xlane.xlu0 %3385 }
 0x3a0   : > { %v3475_v31 = vadd.f32 %v5581_v49, %v3386_v30 }
 0x3a1   : > { %3539 = vst.msk [vmem:[%s5587_s17 + $0x1a8] sm:$0xff] %vm3485_vm4, %v3474_v29 }
 0x3a2   : > { %3540 = vst.msk [vmem:[%s5587_s17 + $0x1b0] sm:$0xff] %vm3485_vm4, %v3475_v31  ;;  %v3389_v32 = vpop.xlane.xlu1 %3388 }
 0x3a3   : > { %v3476_v33 = vadd.f32 %v5581_v49, %v3389_v32  ;;  %v3392_v34 = vpop.xlane.xlu0 %3391 }
 0x3a4   : > { %v3477_v36 = vadd.f32 %v5581_v49, %v3392_v34 }
 0x3a5   : > { %3541 = vst.msk [vmem:[%s5587_s17 + $0x1b8] sm:$0xff] %vm3485_vm4, %v3476_v33 }
 0x3a6   : > { %3542 = vst.msk [vmem:[%s5587_s17 + $0x1c0] sm:$0xff] %vm3485_vm4, %v3477_v36  ;;  %v3395_v37 = vpop.xlane.xlu1 %3394 }
 0x3a7   : > { %v3478_v38 = vadd.f32 %v5581_v49, %v3395_v37  ;;  %v3398_v39 = vpop.xlane.xlu0 %3397 }
 0x3a8   : > { %v3479_v40 = vadd.f32 %v5581_v49, %v3398_v39 }
 0x3a9   : > { %3543 = vst.msk [vmem:[%s5587_s17 + $0x1c8] sm:$0xff] %vm3485_vm4, %v3478_v38 }
 0x3aa   : > { %3544 = vst.msk [vmem:[%s5587_s17 + $0x1d0] sm:$0xff] %vm3485_vm4, %v3479_v40  ;;  %v3401_v41 = vpop.xlane.xlu1 %3400 }
 0x3ab   : > { %v3480_v35 = vadd.f32 %v5581_v49, %v3401_v41  ;;  %v3404_v43 = vpop.xlane.xlu0 %3403 }
 0x3ac   : > { %v3481_v45 = vadd.f32 %v5581_v49, %v3404_v43 }
 0x3ad   : > { %3545 = vst.msk [vmem:[%s5587_s17 + $0x1d8] sm:$0xff] %vm3485_vm4, %v3480_v35 }
 0x3ae   : > { %3546 = vst.msk [vmem:[%s5587_s17 + $0x1e0] sm:$0xff] %vm3485_vm4, %v3481_v45  ;;  %v3407_v46 = vpop.xlane.xlu1 %3406 }
 0x3af   : > { %v3482_v47 = vadd.f32 %v5581_v49, %v3407_v46  ;;  %v3410_v44 = vpop.xlane.xlu0 %3409 }
 0x3b0   : > { %v3483_v48 = vadd.f32 %v5581_v49, %v3410_v44 }
 0x3b1   : > { %3547 = vst.msk [vmem:[%s5587_s17 + $0x1e8] sm:$0xff] %vm3485_vm4, %v3482_v47 }
 0x3b2   : > { %3548 = vst.msk [vmem:[%s5587_s17 + $0x1f0] sm:$0xff] %vm3485_vm4, %v3483_v48  ;;  %v3413_v42 = vpop.xlane.xlu1 %3412 }
 0x3b3   : > { %v3484_v50 = vadd.f32 %v5581_v49, %v3413_v42 }
 0x3b5   : > { %3549 = vst.msk [vmem:[%s5587_s17 + $0x1f8] sm:$0xff] %vm3485_vm4, %v3484_v50 }
 0x3b6 PF: > { %s23_s19 = sadd.s32 1, %s4710_s19  }
 0x3b7   : > { %p20_p4 = scmp.ge.s32.totalorder %s23_s19, 6  }
 0x3b9   :  { %22 = sbr.rel (!%p20_p4) target bundleno = 3 (0x3), region = 97 }

</bundles_post_ra>
